<compile_context>
chip_gen: v5e
topology: v5e:2x2
jax: 0.10.0
libtpu: 0.0.40
codegen_flags: <defaults>
</compile_context>

<pallas_src>
import functools

import jax
import jax.numpy as jnp
from jax import lax
from jax.experimental import pallas as pl
from jax.experimental.pallas import tpu as pltpu


def _round_up(x, mult):
    return (x + mult - 1) // mult * mult


def _pick_t_oh(ho, wo, max_positions):
    """Output-row block size: divides Ho and keeps the output tile's minor dim
    (t_oh*Wo) either a multiple of 128 (lane-dense stores) or the full Ho*Wo."""
    cands = [t for t in range(1, ho + 1)
             if ho % t == 0 and (t == ho or (t * wo) % 128 == 0)]
    fitting = [t for t in cands if t * wo <= max_positions]
    if fitting:
        return max(fitting)
    return min(cands)


def _vmem_limit_bytes():
    cap = 64 * 1024 * 1024
    try:
        info = pltpu.get_tpu_info()
        cap = int(getattr(info, "vmem_capacity_bytes", cap) or cap)
    except Exception:
        pass
    # Leave 1/4 of physical VMEM as headroom (48 MiB on v7x, 96 MiB on v5e/v6e).
    return min(cap * 3 // 4, 96 * 1024 * 1024)


# ---------------------------------------------------------------------------
# Shared conv tile: 9 accumulating (P, Cin) @ (Cin, Cout) matmuls, bias, ReLU.
# ---------------------------------------------------------------------------
def _conv_tile(x_ref, w_ref, bias_ref, oh0, *, t_oh, wo, cout, ksize, stride):
    """Conv + bias + ReLU for output rows [oh0, oh0 + t_oh) of one sample.

    x_ref:    (1, ksize, stride, Hs*Wo, Cin) bf16  -- per-kw column-gathered,
              row space-to-depth input: every tap below is one contiguous
              2-D dynamic slice.
    w_ref:    (ksize*ksize, Cin, Cout) bf16, tap-major (kh*ksize + kw).
    bias_ref: (1, Cout) f32.
    Returns (t_oh*Wo, Cout) f32, post-ReLU.
    """
    p = t_oh * wo
    acc = jnp.zeros((p, cout), jnp.float32)
    for kh in range(ksize):
        for kw in range(ksize):
            row0 = pl.multiple_of((oh0 + kh // stride) * wo, wo)
            sub = x_ref[0, kw, kh % stride, pl.ds(row0, p), :]      # (P, Cin)
            acc += jnp.dot(sub, w_ref[kh * ksize + kw],
                           preferred_element_type=jnp.float32)
    return jnp.maximum(acc + bias_ref[...], 0.0)


# ---------------------------------------------------------------------------
# Phase 1: conv + ReLU, emit per-tile BN partial sums only (no y in HBM).
# ---------------------------------------------------------------------------
def _conv_stats_kernel(x_ref, w_ref, bias_ref, stats_ref, *,
                       t_oh, wo, cout, ksize, stride):
    oh0 = pl.program_id(1) * t_oh
    y = _conv_tile(x_ref, w_ref, bias_ref, oh0,
                   t_oh=t_oh, wo=wo, cout=cout, ksize=ksize, stride=stride)
    # Shift by relu(bias) (cheap proxy for the channel mean) before the
    # sum / sum-of-squares to avoid E[y^2] - E[y]^2 cancellation.
    yc = y - jnp.maximum(bias_ref[...], 0.0)
    stats_ref[0, 0, 0:1, :] = jnp.sum(yc, axis=0, keepdims=True)
    stats_ref[0, 0, 1:2, :] = jnp.sum(yc * yc, axis=0, keepdims=True)


# ---------------------------------------------------------------------------
# Phase 2: recompute conv + ReLU, fuse BN scale/shift, store channel-major
# so the HBM output is already NCHW with the real Cout.
# ---------------------------------------------------------------------------
def _conv_bn_kernel(x_ref, w_ref, bias_ref, params_ref, out_ref, *,
                    t_oh, wo, cout, ksize, stride):
    oh0 = pl.program_id(1) * t_oh
    y = _conv_tile(x_ref, w_ref, bias_ref, oh0,
                   t_oh=t_oh, wo=wo, cout=cout, ksize=ksize, stride=stride)
    y = y * params_ref[0:1, :] + params_ref[1:2, :]
    out_ref[0] = y.T                                   # (Cout, t_oh*Wo) == NCHW


@functools.partial(jax.jit,
                   static_argnames=("kernel_size", "stride", "padding",
                                    "max_tile_positions"))
def conv_layer_forward(x_nchw, conv_w, conv_b, bn_gamma, bn_beta, *,
                       kernel_size=3, stride=2, padding=1,
                       max_tile_positions=2048):
    """Forward of ConvLayer: Conv2d -> ReLU -> BatchNorm2d (batch stats).

    x_nchw: (N, Cin, H, W) f32.  conv_w: (Cout, Cin, kH, kW).  Returns NCHW f32.
    """
    n, cin, h, w = x_nchw.shape
    cout = conv_w.shape[0]
    s, k = stride, kernel_size
    ho = (h + 2 * padding - k) // s + 1
    wo = (w + 2 * padding - k) // s + 1
    hs = ho + (k - 1) // s              # rows per parity plane after space-to-depth
    ht = s * hs                         # padded rows consumed by the split below
    cin_p = _round_up(cin, 8)           # pad only the contraction dim (free in VMEM)

    # ---- Input prep (single input-sized pass, fuses with NHWC/bf16 cast):
    # pad, gather the k column phases (im2col along W only) and space-to-depth
    # the rows by the stride.  No full im2col matrix in HBM.
    x_nhwc = jnp.transpose(x_nchw, (0, 2, 3, 1)).astype(jnp.bfloat16)
    xp = jnp.pad(x_nhwc, ((0, 0),
                          (padding, max(0, ht - h - padding)),
                          (padding, padding),
                          (0, cin_p - cin)))[:, :ht, :, :]
    cols = [xp[:, :, kw:kw + s * (wo - 1) + 1:s, :] for kw in range(k)]
    xg = jnp.stack(cols, axis=1)                              # (N, k, ht, Wo, Cin)
    xg = xg.reshape(n, k, hs, s, wo, cin_p).transpose(0, 1, 3, 2, 4, 5)
    xg = xg.reshape(n, k, s, hs * wo, cin_p)                  # (N, k, s, Hs*Wo, Cin)
    # TODO(synk): a pure space-to-depth layout (1x input instead of k/s x)
    # would shave the remaining wrapper traffic at the cost of an in-kernel
    # (t_oh, Wo, Cin) -> (t_oh*Wo, Cin) reshape.

    # ---- Weights tap-major (kh*k + kw, Cin, Cout), bf16 for the MXU; bias f32.
    wk = jnp.transpose(conv_w, (2, 3, 1, 0)).reshape(k * k, cin, cout)
    wk = jnp.pad(wk, ((0, 0), (0, cin_p - cin), (0, 0))).astype(jnp.bfloat16)
    bias = conv_b.astype(jnp.float32).reshape(1, cout)

    t_oh = _pick_t_oh(ho, wo, max_tile_positions)
    r_blocks = ho // t_oh
    grid = (n, r_blocks)

    cparams = pltpu.CompilerParams(
        dimension_semantics=("parallel", "parallel"),
        vmem_limit_bytes=_vmem_limit_bytes(),
    )
    x_spec = pl.BlockSpec((1, k, s, hs * wo, cin_p),
                          lambda ni, ri: (ni, 0, 0, 0, 0))      # resident across ri
    w_spec = pl.BlockSpec((k * k, cin_p, cout), lambda ni, ri: (0, 0, 0))
    b_spec = pl.BlockSpec((1, cout), lambda ni, ri: (0, 0))
    common = dict(t_oh=t_oh, wo=wo, cout=cout, ksize=k, stride=s)

    # ---- Phase 1: per-tile BN partial sums (parallel-safe, tiny HBM writes).
    stats = pl.pallas_call(
        functools.partial(_conv_stats_kernel, **common),
        out_shape=jax.ShapeDtypeStruct((n, r_blocks, 2, cout), jnp.float32),
        grid=grid,
        in_specs=[x_spec, w_spec, b_spec],
        out_specs=pl.BlockSpec((1, 1, 2, cout), lambda ni, ri: (ni, ri, 0, 0)),
        compiler_params=cparams,
    )(xg, wk, bias)

    # ---- Tiny cross-tile reduction + fold BN (batch stats, eps=1e-5).
    m_total = n * ho * wo
    ssum = jnp.sum(stats, axis=(0, 1))                          # (2, Cout)
    c = jnp.maximum(bias[0], 0.0)
    mean_c = ssum[0] / m_total                                  # E[y - c]
    var = jnp.maximum(ssum[1] / m_total - mean_c * mean_c, 0.0)
    inv = lax.rsqrt(var + 1e-5)
    scale = bn_gamma.astype(jnp.float32) * inv
    shift = bn_beta.astype(jnp.float32) - (mean_c + c) * scale
    params = jnp.stack([scale, shift], axis=0)                  # (2, Cout)

    # ---- Phase 2: recompute conv (MXU has slack) + fused BN affine; single
    # full-size HBM write, already channel-major (NCHW), real Cout.
    out3 = pl.pallas_call(
        functools.partial(_conv_bn_kernel, **common),
        out_shape=jax.ShapeDtypeStruct((n, cout, ho * wo), jnp.float32),
        grid=grid,
        in_specs=[x_spec, w_spec, b_spec,
                  pl.BlockSpec((2, cout), lambda ni, ri: (0, 0))],
        out_specs=pl.BlockSpec((1, cout, t_oh * wo), lambda ni, ri: (ni, 0, ri)),
        compiler_params=cparams,
    )(xg, wk, bias, params)

    return out3.reshape(n, cout, ho, wo)                        # free reshape


def _reference(x_nchw, conv_w, conv_b, bn_gamma, bn_beta, stride, padding):
    # Matches the kernel numerics: bf16-rounded conv operands, f32 accumulation.
    xb = x_nchw.astype(jnp.bfloat16).astype(jnp.float32)
    wb = conv_w.astype(jnp.bfloat16).astype(jnp.float32)
    y = lax.conv_general_dilated(
        xb, wb,
        window_strides=(stride, stride),
        padding=((padding, padding), (padding, padding)),
        dimension_numbers=("NCHW", "OIHW", "NCHW"),
    ) + conv_b.reshape(1, -1, 1, 1)
    y = jnp.maximum(y, 0.0)
    mean = jnp.mean(y, axis=(0, 2, 3), keepdims=True)
    var = jnp.mean((y - mean) ** 2, axis=(0, 2, 3), keepdims=True)
    return (y - mean) * lax.rsqrt(var + 1e-5) * bn_gamma.reshape(1, -1, 1, 1) \
        + bn_beta.reshape(1, -1, 1, 1)


if __name__ == "__main__":
    ksz, pad = 3, 1

    # (a) ConvLayer(4, 8): in != out -> stride stays 2 (module rule).
    in_c, out_c = 4, 8
    stride_a = 1 if in_c == out_c else 2
    k_x, k_w, k_b, k_g, k_be = jax.random.split(jax.random.PRNGKey(0), 5)
    x = jax.random.normal(k_x, (2, in_c, 16, 16), dtype=jnp.float32)
    conv_w = 0.1 * jax.random.normal(k_w, (out_c, in_c, ksz, ksz), dtype=jnp.float32)
    conv_b = 0.1 * jax.random.normal(k_b, (out_c,), dtype=jnp.float32)
    gamma = 1.0 + 0.1 * jax.random.normal(k_g, (out_c,), dtype=jnp.float32)
    beta = 0.1 * jax.random.normal(k_be, (out_c,), dtype=jnp.float32)

    out = conv_layer_forward(x, conv_w, conv_b, gamma, beta,
                             kernel_size=ksz, stride=stride_a, padding=pad)
    out = jax.block_until_ready(out)
    ref = _reference(x, conv_w, conv_b, gamma, beta, stride_a, pad)
    assert out.shape == (2, out_c, 8, 8), out.shape
    err_a = float(jnp.max(jnp.abs(out - ref)))
    assert jnp.allclose(out, ref, atol=2e-3, rtol=2e-3), err_a

    # (b) ConvLayer(8, 8): in == out -> stride 1 (module rule); small tile cap
    #     forces two output-row blocks per sample (multi-tile stats, dynamic oh0).
    in_c2 = out_c2 = 8
    stride_b = 1 if in_c2 == out_c2 else 2
    k_x2, k_w2, k_b2, k_g2, k_be2 = jax.random.split(jax.random.PRNGKey(1), 5)
    x2 = jax.random.normal(k_x2, (2, in_c2, 32, 32), dtype=jnp.float32)
    conv_w2 = 0.1 * jax.random.normal(k_w2, (out_c2, in_c2, ksz, ksz), dtype=jnp.float32)
    conv_b2 = 0.1 * jax.random.normal(k_b2, (out_c2,), dtype=jnp.float32)
    gamma2 = 1.0 + 0.1 * jax.random.normal(k_g2, (out_c2,), dtype=jnp.float32)
    beta2 = 0.1 * jax.random.normal(k_be2, (out_c2,), dtype=jnp.float32)

    out2 = conv_layer_forward(x2, conv_w2, conv_b2, gamma2, beta2,
                              kernel_size=ksz, stride=stride_b, padding=pad,
                              max_tile_positions=512)
    out2 = jax.block_until_ready(out2)
    ref2 = _reference(x2, conv_w2, conv_b2, gamma2, beta2, stride_b, pad)
    assert out2.shape == (2, out_c2, 32, 32), out2.shape
    err_b = float(jnp.max(jnp.abs(out2 - ref2)))
    assert jnp.allclose(out2, ref2, atol=2e-3, rtol=2e-3), err_b

    print("KERNEL_OK")
</pallas_src>

<mosaic_0001>
module attributes {stable_mosaic.version = 11 : i64} {
  func.func @_conv_stats_kernel(%arg0: i32, %arg1: i32, %arg2: memref<1x3x2x72x8xbf16, #tpu.memory_space<vmem>>, %arg3: memref<9x8x8xbf16, #tpu.memory_space<vmem>>, %arg4: memref<1x8xf32, #tpu.memory_space<vmem>>, %arg5: memref<1x1x2x8xf32, #tpu.memory_space<vmem>>) attributes {dimension_semantics = [#tpu.dimension_semantics<parallel>, #tpu.dimension_semantics<parallel>], iteration_bounds = array<i64: 2, 1>, scalar_prefetch = 0 : i64, scratch_operands = 0 : i64, tpu.core_type = #tpu.core_type<tc>, window_params = [{transform_indices = @transform_0, window_bounds = array<i64: 1, 3, 2, 72, 8>}, {pipeline_mode = #tpu.pipeline_mode<synchronous>, transform_indices = @transform_1, window_bounds = array<i64: 9, 8, 8>}, {pipeline_mode = #tpu.pipeline_mode<synchronous>, transform_indices = @transform_2, window_bounds = array<i64: 1, 8>}, {transform_indices = @transform_3, window_bounds = array<i64: 1, 1, 2, 8>}]} {
    %c8_i32 = arith.constant 8 : i32
    %0 = arith.muli %arg1, %c8_i32 : i32
    %cst = arith.constant 0.000000e+00 : f32
    %1 = vector.broadcast %cst : f32 to vector<64x8xf32>
    %c0_i32 = arith.constant 0 : i32
    %2 = arith.addi %0, %c0_i32 : i32
    %c8_i32_0 = arith.constant 8 : i32
    %3 = arith.muli %2, %c8_i32_0 : i32
    %4 = tpu.assume_multiple %3, 8 : i32
    %c0 = arith.constant 0 : index
    %c0_1 = arith.constant 0 : index
    %c0_2 = arith.constant 0 : index
    %5 = arith.index_cast %4 : i32 to index
    %c0_3 = arith.constant 0 : index
    %6 = vector.load %arg2[%c0, %c0_1, %c0_2, %5, %c0_3] : memref<1x3x2x72x8xbf16, #tpu.memory_space<vmem>>, vector<1x1x1x64x8xbf16>
    %7 = vector.shape_cast %6 : vector<1x1x1x64x8xbf16> to vector<64x8xbf16>
    %c0_4 = arith.constant 0 : index
    %c0_5 = arith.constant 0 : index
    %c0_6 = arith.constant 0 : index
    %8 = vector.load %arg3[%c0_4, %c0_5, %c0_6] : memref<9x8x8xbf16, #tpu.memory_space<vmem>>, vector<1x8x8xbf16>
    %9 = vector.shape_cast %8 : vector<1x8x8xbf16> to vector<8x8xbf16>
    %cst_7 = arith.constant dense<0.000000e+00> : vector<64x8xf32>
    %10 = tpu.matmul %7, %9, %cst_7 {dimension_numbers = #tpu.dot_dimension_numbers<[1], [0], [0], [1], [0, 0, 1, 1], [], []>} : vector<64x8xbf16>, vector<8x8xbf16>, vector<64x8xf32> -> vector<64x8xf32>
    %11 = arith.addf %1, %10 : vector<64x8xf32>
    %c0_i32_8 = arith.constant 0 : i32
    %12 = arith.addi %0, %c0_i32_8 : i32
    %c8_i32_9 = arith.constant 8 : i32
    %13 = arith.muli %12, %c8_i32_9 : i32
    %14 = tpu.assume_multiple %13, 8 : i32
    %c0_10 = arith.constant 0 : index
    %c1 = arith.constant 1 : index
    %c0_11 = arith.constant 0 : index
    %15 = arith.index_cast %14 : i32 to index
    %c0_12 = arith.constant 0 : index
    %16 = vector.load %arg2[%c0_10, %c1, %c0_11, %15, %c0_12] : memref<1x3x2x72x8xbf16, #tpu.memory_space<vmem>>, vector<1x1x1x64x8xbf16>
    %17 = vector.shape_cast %16 : vector<1x1x1x64x8xbf16> to vector<64x8xbf16>
    %c1_13 = arith.constant 1 : index
    %c0_14 = arith.constant 0 : index
    %c0_15 = arith.constant 0 : index
    %18 = vector.load %arg3[%c1_13, %c0_14, %c0_15] : memref<9x8x8xbf16, #tpu.memory_space<vmem>>, vector<1x8x8xbf16>
    %19 = vector.shape_cast %18 : vector<1x8x8xbf16> to vector<8x8xbf16>
    %cst_16 = arith.constant dense<0.000000e+00> : vector<64x8xf32>
    %20 = tpu.matmul %17, %19, %cst_16 {dimension_numbers = #tpu.dot_dimension_numbers<[1], [0], [0], [1], [0, 0, 1, 1], [], []>} : vector<64x8xbf16>, vector<8x8xbf16>, vector<64x8xf32> -> vector<64x8xf32>
    %21 = arith.addf %11, %20 : vector<64x8xf32>
    %c0_i32_17 = arith.constant 0 : i32
    %22 = arith.addi %0, %c0_i32_17 : i32
    %c8_i32_18 = arith.constant 8 : i32
    %23 = arith.muli %22, %c8_i32_18 : i32
    %24 = tpu.assume_multiple %23, 8 : i32
    %c0_19 = arith.constant 0 : index
    %c2 = arith.constant 2 : index
    %c0_20 = arith.constant 0 : index
    %25 = arith.index_cast %24 : i32 to index
    %c0_21 = arith.constant 0 : index
    %26 = vector.load %arg2[%c0_19, %c2, %c0_20, %25, %c0_21] : memref<1x3x2x72x8xbf16, #tpu.memory_space<vmem>>, vector<1x1x1x64x8xbf16>
    %27 = vector.shape_cast %26 : vector<1x1x1x64x8xbf16> to vector<64x8xbf16>
    %c2_22 = arith.constant 2 : index
    %c0_23 = arith.constant 0 : index
    %c0_24 = arith.constant 0 : index
    %28 = vector.load %arg3[%c2_22, %c0_23, %c0_24] : memref<9x8x8xbf16, #tpu.memory_space<vmem>>, vector<1x8x8xbf16>
    %29 = vector.shape_cast %28 : vector<1x8x8xbf16> to vector<8x8xbf16>
    %cst_25 = arith.constant dense<0.000000e+00> : vector<64x8xf32>
    %30 = tpu.matmul %27, %29, %cst_25 {dimension_numbers = #tpu.dot_dimension_numbers<[1], [0], [0], [1], [0, 0, 1, 1], [], []>} : vector<64x8xbf16>, vector<8x8xbf16>, vector<64x8xf32> -> vector<64x8xf32>
    %31 = arith.addf %21, %30 : vector<64x8xf32>
    %c0_i32_26 = arith.constant 0 : i32
    %32 = arith.addi %0, %c0_i32_26 : i32
    %c8_i32_27 = arith.constant 8 : i32
    %33 = arith.muli %32, %c8_i32_27 : i32
    %34 = tpu.assume_multiple %33, 8 : i32
    %c0_28 = arith.constant 0 : index
    %c0_29 = arith.constant 0 : index
    %c1_30 = arith.constant 1 : index
    %35 = arith.index_cast %34 : i32 to index
    %c0_31 = arith.constant 0 : index
    %36 = vector.load %arg2[%c0_28, %c0_29, %c1_30, %35, %c0_31] : memref<1x3x2x72x8xbf16, #tpu.memory_space<vmem>>, vector<1x1x1x64x8xbf16>
    %37 = vector.shape_cast %36 : vector<1x1x1x64x8xbf16> to vector<64x8xbf16>
    %c3 = arith.constant 3 : index
    %c0_32 = arith.constant 0 : index
    %c0_33 = arith.constant 0 : index
    %38 = vector.load %arg3[%c3, %c0_32, %c0_33] : memref<9x8x8xbf16, #tpu.memory_space<vmem>>, vector<1x8x8xbf16>
    %39 = vector.shape_cast %38 : vector<1x8x8xbf16> to vector<8x8xbf16>
    %cst_34 = arith.constant dense<0.000000e+00> : vector<64x8xf32>
    %40 = tpu.matmul %37, %39, %cst_34 {dimension_numbers = #tpu.dot_dimension_numbers<[1], [0], [0], [1], [0, 0, 1, 1], [], []>} : vector<64x8xbf16>, vector<8x8xbf16>, vector<64x8xf32> -> vector<64x8xf32>
    %41 = arith.addf %31, %40 : vector<64x8xf32>
    %c0_i32_35 = arith.constant 0 : i32
    %42 = arith.addi %0, %c0_i32_35 : i32
    %c8_i32_36 = arith.constant 8 : i32
    %43 = arith.muli %42, %c8_i32_36 : i32
    %44 = tpu.assume_multiple %43, 8 : i32
    %c0_37 = arith.constant 0 : index
    %c1_38 = arith.constant 1 : index
    %c1_39 = arith.constant 1 : index
    %45 = arith.index_cast %44 : i32 to index
    %c0_40 = arith.constant 0 : index
    %46 = vector.load %arg2[%c0_37, %c1_38, %c1_39, %45, %c0_40] : memref<1x3x2x72x8xbf16, #tpu.memory_space<vmem>>, vector<1x1x1x64x8xbf16>
    %47 = vector.shape_cast %46 : vector<1x1x1x64x8xbf16> to vector<64x8xbf16>
    %c4 = arith.constant 4 : index
    %c0_41 = arith.constant 0 : index
    %c0_42 = arith.constant 0 : index
    %48 = vector.load %arg3[%c4, %c0_41, %c0_42] : memref<9x8x8xbf16, #tpu.memory_space<vmem>>, vector<1x8x8xbf16>
    %49 = vector.shape_cast %48 : vector<1x8x8xbf16> to vector<8x8xbf16>
    %cst_43 = arith.constant dense<0.000000e+00> : vector<64x8xf32>
    %50 = tpu.matmul %47, %49, %cst_43 {dimension_numbers = #tpu.dot_dimension_numbers<[1], [0], [0], [1], [0, 0, 1, 1], [], []>} : vector<64x8xbf16>, vector<8x8xbf16>, vector<64x8xf32> -> vector<64x8xf32>
    %51 = arith.addf %41, %50 : vector<64x8xf32>
    %c0_i32_44 = arith.constant 0 : i32
    %52 = arith.addi %0, %c0_i32_44 : i32
    %c8_i32_45 = arith.constant 8 : i32
    %53 = arith.muli %52, %c8_i32_45 : i32
    %54 = tpu.assume_multiple %53, 8 : i32
    %c0_46 = arith.constant 0 : index
    %c2_47 = arith.constant 2 : index
    %c1_48 = arith.constant 1 : index
    %55 = arith.index_cast %54 : i32 to index
    %c0_49 = arith.constant 0 : index
    %56 = vector.load %arg2[%c0_46, %c2_47, %c1_48, %55, %c0_49] : memref<1x3x2x72x8xbf16, #tpu.memory_space<vmem>>, vector<1x1x1x64x8xbf16>
    %57 = vector.shape_cast %56 : vector<1x1x1x64x8xbf16> to vector<64x8xbf16>
    %c5 = arith.constant 5 : index
    %c0_50 = arith.constant 0 : index
    %c0_51 = arith.constant 0 : index
    %58 = vector.load %arg3[%c5, %c0_50, %c0_51] : memref<9x8x8xbf16, #tpu.memory_space<vmem>>, vector<1x8x8xbf16>
    %59 = vector.shape_cast %58 : vector<1x8x8xbf16> to vector<8x8xbf16>
    %cst_52 = arith.constant dense<0.000000e+00> : vector<64x8xf32>
    %60 = tpu.matmul %57, %59, %cst_52 {dimension_numbers = #tpu.dot_dimension_numbers<[1], [0], [0], [1], [0, 0, 1, 1], [], []>} : vector<64x8xbf16>, vector<8x8xbf16>, vector<64x8xf32> -> vector<64x8xf32>
    %61 = arith.addf %51, %60 : vector<64x8xf32>
    %c1_i32 = arith.constant 1 : i32
    %62 = arith.addi %0, %c1_i32 : i32
    %c8_i32_53 = arith.constant 8 : i32
    %63 = arith.muli %62, %c8_i32_53 : i32
    %64 = tpu.assume_multiple %63, 8 : i32
    %c0_54 = arith.constant 0 : index
    %c0_55 = arith.constant 0 : index
    %c0_56 = arith.constant 0 : index
    %65 = arith.index_cast %64 : i32 to index
    %c0_57 = arith.constant 0 : index
    %66 = vector.load %arg2[%c0_54, %c0_55, %c0_56, %65, %c0_57] : memref<1x3x2x72x8xbf16, #tpu.memory_space<vmem>>, vector<1x1x1x64x8xbf16>
    %67 = vector.shape_cast %66 : vector<1x1x1x64x8xbf16> to vector<64x8xbf16>
    %c6 = arith.constant 6 : index
    %c0_58 = arith.constant 0 : index
    %c0_59 = arith.constant 0 : index
    %68 = vector.load %arg3[%c6, %c0_58, %c0_59] : memref<9x8x8xbf16, #tpu.memory_space<vmem>>, vector<1x8x8xbf16>
    %69 = vector.shape_cast %68 : vector<1x8x8xbf16> to vector<8x8xbf16>
    %cst_60 = arith.constant dense<0.000000e+00> : vector<64x8xf32>
    %70 = tpu.matmul %67, %69, %cst_60 {dimension_numbers = #tpu.dot_dimension_numbers<[1], [0], [0], [1], [0, 0, 1, 1], [], []>} : vector<64x8xbf16>, vector<8x8xbf16>, vector<64x8xf32> -> vector<64x8xf32>
    %71 = arith.addf %61, %70 : vector<64x8xf32>
    %c1_i32_61 = arith.constant 1 : i32
    %72 = arith.addi %0, %c1_i32_61 : i32
    %c8_i32_62 = arith.constant 8 : i32
    %73 = arith.muli %72, %c8_i32_62 : i32
    %74 = tpu.assume_multiple %73, 8 : i32
    %c0_63 = arith.constant 0 : index
    %c1_64 = arith.constant 1 : index
    %c0_65 = arith.constant 0 : index
    %75 = arith.index_cast %74 : i32 to index
    %c0_66 = arith.constant 0 : index
    %76 = vector.load %arg2[%c0_63, %c1_64, %c0_65, %75, %c0_66] : memref<1x3x2x72x8xbf16, #tpu.memory_space<vmem>>, vector<1x1x1x64x8xbf16>
    %77 = vector.shape_cast %76 : vector<1x1x1x64x8xbf16> to vector<64x8xbf16>
    %c7 = arith.constant 7 : index
    %c0_67 = arith.constant 0 : index
    %c0_68 = arith.constant 0 : index
    %78 = vector.load %arg3[%c7, %c0_67, %c0_68] : memref<9x8x8xbf16, #tpu.memory_space<vmem>>, vector<1x8x8xbf16>
    %79 = vector.shape_cast %78 : vector<1x8x8xbf16> to vector<8x8xbf16>
    %cst_69 = arith.constant dense<0.000000e+00> : vector<64x8xf32>
    %80 = tpu.matmul %77, %79, %cst_69 {dimension_numbers = #tpu.dot_dimension_numbers<[1], [0], [0], [1], [0, 0, 1, 1], [], []>} : vector<64x8xbf16>, vector<8x8xbf16>, vector<64x8xf32> -> vector<64x8xf32>
    %81 = arith.addf %71, %80 : vector<64x8xf32>
    %c1_i32_70 = arith.constant 1 : i32
    %82 = arith.addi %0, %c1_i32_70 : i32
    %c8_i32_71 = arith.constant 8 : i32
    %83 = arith.muli %82, %c8_i32_71 : i32
    %84 = tpu.assume_multiple %83, 8 : i32
    %c0_72 = arith.constant 0 : index
    %c2_73 = arith.constant 2 : index
    %c0_74 = arith.constant 0 : index
    %85 = arith.index_cast %84 : i32 to index
    %c0_75 = arith.constant 0 : index
    %86 = vector.load %arg2[%c0_72, %c2_73, %c0_74, %85, %c0_75] : memref<1x3x2x72x8xbf16, #tpu.memory_space<vmem>>, vector<1x1x1x64x8xbf16>
    %87 = vector.shape_cast %86 : vector<1x1x1x64x8xbf16> to vector<64x8xbf16>
    %c8 = arith.constant 8 : index
    %c0_76 = arith.constant 0 : index
    %c0_77 = arith.constant 0 : index
    %88 = vector.load %arg3[%c8, %c0_76, %c0_77] : memref<9x8x8xbf16, #tpu.memory_space<vmem>>, vector<1x8x8xbf16>
    %89 = vector.shape_cast %88 : vector<1x8x8xbf16> to vector<8x8xbf16>
    %cst_78 = arith.constant dense<0.000000e+00> : vector<64x8xf32>
    %90 = tpu.matmul %87, %89, %cst_78 {dimension_numbers = #tpu.dot_dimension_numbers<[1], [0], [0], [1], [0, 0, 1, 1], [], []>} : vector<64x8xbf16>, vector<8x8xbf16>, vector<64x8xf32> -> vector<64x8xf32>
    %91 = arith.addf %81, %90 : vector<64x8xf32>
    %c0_79 = arith.constant 0 : index
    %c0_80 = arith.constant 0 : index
    %92 = vector.load %arg4[%c0_79, %c0_80] : memref<1x8xf32, #tpu.memory_space<vmem>>, vector<1x8xf32>
    %93 = vector.broadcast %92 : vector<1x8xf32> to vector<64x8xf32>
    %94 = arith.addf %91, %93 : vector<64x8xf32>
    %cst_81 = arith.constant 0.000000e+00 : f32
    %95 = vector.broadcast %cst_81 : f32 to vector<64x8xf32>
    %96 = arith.maximumf %94, %95 : vector<64x8xf32>
    %c0_82 = arith.constant 0 : index
    %c0_83 = arith.constant 0 : index
    %97 = vector.load %arg4[%c0_82, %c0_83] : memref<1x8xf32, #tpu.memory_space<vmem>>, vector<1x8xf32>
    %cst_84 = arith.constant 0.000000e+00 : f32
    %98 = vector.broadcast %cst_84 : f32 to vector<1x8xf32>
    %99 = arith.maximumf %97, %98 : vector<1x8xf32>
    %100 = vector.broadcast %99 : vector<1x8xf32> to vector<64x8xf32>
    %101 = arith.subf %96, %100 : vector<64x8xf32>
    %cst_85 = arith.constant dense<0.000000e+00> : vector<8xf32>
    %102 = vector.multi_reduction <add>, %101, %cst_85 [0] : vector<64x8xf32> to vector<8xf32>
    %103 = vector.shape_cast %102 : vector<8xf32> to vector<1x8xf32>
    %c0_86 = arith.constant 0 : index
    %c0_87 = arith.constant 0 : index
    %c0_88 = arith.constant 0 : index
    %c0_89 = arith.constant 0 : index
    %104 = vector.load %arg5[%c0_86, %c0_87, %c0_88, %c0_89] : memref<1x1x2x8xf32, #tpu.memory_space<vmem>>, vector<1x1x1x8xf32>
    %105 = vector.shape_cast %104 : vector<1x1x1x8xf32> to vector<1x8xf32>
    %106 = vector.shape_cast %103 : vector<1x8xf32> to vector<1x1x1x8xf32>
    tpu.vector_store %arg5[%c0_86, %c0_87, %c0_88, %c0_89], %106 {strides = array<i32>} : memref<1x1x2x8xf32, #tpu.memory_space<vmem>>, vector<1x1x1x8xf32>,
    %107 = arith.mulf %101, %101 : vector<64x8xf32>
    %cst_90 = arith.constant dense<0.000000e+00> : vector<8xf32>
    %108 = vector.multi_reduction <add>, %107, %cst_90 [0] : vector<64x8xf32> to vector<8xf32>
    %109 = vector.shape_cast %108 : vector<8xf32> to vector<1x8xf32>
    %c0_91 = arith.constant 0 : index
    %c0_92 = arith.constant 0 : index
    %c1_93 = arith.constant 1 : index
    %c0_94 = arith.constant 0 : index
    %110 = vector.load %arg5[%c0_91, %c0_92, %c1_93, %c0_94] : memref<1x1x2x8xf32, #tpu.memory_space<vmem>>, vector<1x1x1x8xf32>
    %111 = vector.shape_cast %110 : vector<1x1x1x8xf32> to vector<1x8xf32>
    %112 = vector.shape_cast %109 : vector<1x8xf32> to vector<1x1x1x8xf32>
    tpu.vector_store %arg5[%c0_91, %c0_92, %c1_93, %c0_94], %112 {strides = array<i32>} : memref<1x1x2x8xf32, #tpu.memory_space<vmem>>, vector<1x1x1x8xf32>,
    return
  }
  func.func @transform_0(%arg0: i32, %arg1: i32) -> (i32, i32, i32, i32, i32) {
    %c0_i32 = arith.constant 0 : i32
    %c0_i32_0 = arith.constant 0 : i32
    %c0_i32_1 = arith.constant 0 : i32
    %c0_i32_2 = arith.constant 0 : i32
    %c0_i32_3 = arith.constant 0 : i32
    return %arg0, %c0_i32, %c0_i32_0, %c0_i32_1, %c0_i32_2 : i32, i32, i32, i32, i32
  }
  func.func @transform_1(%arg0: i32, %arg1: i32) -> (i32, i32, i32) {
    %c0_i32 = arith.constant 0 : i32
    %c0_i32_0 = arith.constant 0 : i32
    %c0_i32_1 = arith.constant 0 : i32
    %c0_i32_2 = arith.constant 0 : i32
    return %c0_i32, %c0_i32_0, %c0_i32_1 : i32, i32, i32
  }
  func.func @transform_2(%arg0: i32, %arg1: i32) -> (i32, i32) {
    %c0_i32 = arith.constant 0 : i32
    %c0_i32_0 = arith.constant 0 : i32
    %c0_i32_1 = arith.constant 0 : i32
    return %c0_i32, %c0_i32_0 : i32, i32
  }
  func.func @transform_3(%arg0: i32, %arg1: i32) -> (i32, i32, i32, i32) {
    %c0_i32 = arith.constant 0 : i32
    %c0_i32_0 = arith.constant 0 : i32
    %c0_i32_1 = arith.constant 0 : i32
    return %arg0, %arg1, %c0_i32, %c0_i32_0 : i32, i32, i32, i32
  }
}

module attributes {stable_mosaic.version = 11 : i64} {
  func.func @_conv_bn_kernel(%arg0: i32, %arg1: i32, %arg2: memref<1x3x2x72x8xbf16, #tpu.memory_space<vmem>>, %arg3: memref<9x8x8xbf16, #tpu.memory_space<vmem>>, %arg4: memref<1x8xf32, #tpu.memory_space<vmem>>, %arg5: memref<2x8xf32, #tpu.memory_space<vmem>>, %arg6: memref<1x8x64xf32, #tpu.memory_space<vmem>>) attributes {dimension_semantics = [#tpu.dimension_semantics<parallel>, #tpu.dimension_semantics<parallel>], iteration_bounds = array<i64: 2, 1>, scalar_prefetch = 0 : i64, scratch_operands = 0 : i64, tpu.core_type = #tpu.core_type<tc>, window_params = [{transform_indices = @transform_0, window_bounds = array<i64: 1, 3, 2, 72, 8>}, {pipeline_mode = #tpu.pipeline_mode<synchronous>, transform_indices = @transform_1, window_bounds = array<i64: 9, 8, 8>}, {pipeline_mode = #tpu.pipeline_mode<synchronous>, transform_indices = @transform_2, window_bounds = array<i64: 1, 8>}, {pipeline_mode = #tpu.pipeline_mode<synchronous>, transform_indices = @transform_3, window_bounds = array<i64: 2, 8>}, {transform_indices = @transform_4, window_bounds = array<i64: 1, 8, 64>}]} {
    %c8_i32 = arith.constant 8 : i32
    %0 = arith.muli %arg1, %c8_i32 : i32
    %cst = arith.constant 0.000000e+00 : f32
    %1 = vector.broadcast %cst : f32 to vector<64x8xf32>
    %c0_i32 = arith.constant 0 : i32
    %2 = arith.addi %0, %c0_i32 : i32
    %c8_i32_0 = arith.constant 8 : i32
    %3 = arith.muli %2, %c8_i32_0 : i32
    %4 = tpu.assume_multiple %3, 8 : i32
    %c0 = arith.constant 0 : index
    %c0_1 = arith.constant 0 : index
    %c0_2 = arith.constant 0 : index
    %5 = arith.index_cast %4 : i32 to index
    %c0_3 = arith.constant 0 : index
    %6 = vector.load %arg2[%c0, %c0_1, %c0_2, %5, %c0_3] : memref<1x3x2x72x8xbf16, #tpu.memory_space<vmem>>, vector<1x1x1x64x8xbf16>
    %7 = vector.shape_cast %6 : vector<1x1x1x64x8xbf16> to vector<64x8xbf16>
    %c0_4 = arith.constant 0 : index
    %c0_5 = arith.constant 0 : index
    %c0_6 = arith.constant 0 : index
    %8 = vector.load %arg3[%c0_4, %c0_5, %c0_6] : memref<9x8x8xbf16, #tpu.memory_space<vmem>>, vector<1x8x8xbf16>
    %9 = vector.shape_cast %8 : vector<1x8x8xbf16> to vector<8x8xbf16>
    %cst_7 = arith.constant dense<0.000000e+00> : vector<64x8xf32>
    %10 = tpu.matmul %7, %9, %cst_7 {dimension_numbers = #tpu.dot_dimension_numbers<[1], [0], [0], [1], [0, 0, 1, 1], [], []>} : vector<64x8xbf16>, vector<8x8xbf16>, vector<64x8xf32> -> vector<64x8xf32>
    %11 = arith.addf %1, %10 : vector<64x8xf32>
    %c0_i32_8 = arith.constant 0 : i32
    %12 = arith.addi %0, %c0_i32_8 : i32
    %c8_i32_9 = arith.constant 8 : i32
    %13 = arith.muli %12, %c8_i32_9 : i32
    %14 = tpu.assume_multiple %13, 8 : i32
    %c0_10 = arith.constant 0 : index
    %c1 = arith.constant 1 : index
    %c0_11 = arith.constant 0 : index
    %15 = arith.index_cast %14 : i32 to index
    %c0_12 = arith.constant 0 : index
    %16 = vector.load %arg2[%c0_10, %c1, %c0_11, %15, %c0_12] : memref<1x3x2x72x8xbf16, #tpu.memory_space<vmem>>, vector<1x1x1x64x8xbf16>
    %17 = vector.shape_cast %16 : vector<1x1x1x64x8xbf16> to vector<64x8xbf16>
    %c1_13 = arith.constant 1 : index
    %c0_14 = arith.constant 0 : index
    %c0_15 = arith.constant 0 : index
    %18 = vector.load %arg3[%c1_13, %c0_14, %c0_15] : memref<9x8x8xbf16, #tpu.memory_space<vmem>>, vector<1x8x8xbf16>
    %19 = vector.shape_cast %18 : vector<1x8x8xbf16> to vector<8x8xbf16>
    %cst_16 = arith.constant dense<0.000000e+00> : vector<64x8xf32>
    %20 = tpu.matmul %17, %19, %cst_16 {dimension_numbers = #tpu.dot_dimension_numbers<[1], [0], [0], [1], [0, 0, 1, 1], [], []>} : vector<64x8xbf16>, vector<8x8xbf16>, vector<64x8xf32> -> vector<64x8xf32>
    %21 = arith.addf %11, %20 : vector<64x8xf32>
    %c0_i32_17 = arith.constant 0 : i32
    %22 = arith.addi %0, %c0_i32_17 : i32
    %c8_i32_18 = arith.constant 8 : i32
    %23 = arith.muli %22, %c8_i32_18 : i32
    %24 = tpu.assume_multiple %23, 8 : i32
    %c0_19 = arith.constant 0 : index
    %c2 = arith.constant 2 : index
    %c0_20 = arith.constant 0 : index
    %25 = arith.index_cast %24 : i32 to index
    %c0_21 = arith.constant 0 : index
    %26 = vector.load %arg2[%c0_19, %c2, %c0_20, %25, %c0_21] : memref<1x3x2x72x8xbf16, #tpu.memory_space<vmem>>, vector<1x1x1x64x8xbf16>
    %27 = vector.shape_cast %26 : vector<1x1x1x64x8xbf16> to vector<64x8xbf16>
    %c2_22 = arith.constant 2 : index
    %c0_23 = arith.constant 0 : index
    %c0_24 = arith.constant 0 : index
    %28 = vector.load %arg3[%c2_22, %c0_23, %c0_24] : memref<9x8x8xbf16, #tpu.memory_space<vmem>>, vector<1x8x8xbf16>
    %29 = vector.shape_cast %28 : vector<1x8x8xbf16> to vector<8x8xbf16>
    %cst_25 = arith.constant dense<0.000000e+00> : vector<64x8xf32>
    %30 = tpu.matmul %27, %29, %cst_25 {dimension_numbers = #tpu.dot_dimension_numbers<[1], [0], [0], [1], [0, 0, 1, 1], [], []>} : vector<64x8xbf16>, vector<8x8xbf16>, vector<64x8xf32> -> vector<64x8xf32>
    %31 = arith.addf %21, %30 : vector<64x8xf32>
    %c0_i32_26 = arith.constant 0 : i32
    %32 = arith.addi %0, %c0_i32_26 : i32
    %c8_i32_27 = arith.constant 8 : i32
    %33 = arith.muli %32, %c8_i32_27 : i32
    %34 = tpu.assume_multiple %33, 8 : i32
    %c0_28 = arith.constant 0 : index
    %c0_29 = arith.constant 0 : index
    %c1_30 = arith.constant 1 : index
    %35 = arith.index_cast %34 : i32 to index
    %c0_31 = arith.constant 0 : index
    %36 = vector.load %arg2[%c0_28, %c0_29, %c1_30, %35, %c0_31] : memref<1x3x2x72x8xbf16, #tpu.memory_space<vmem>>, vector<1x1x1x64x8xbf16>
    %37 = vector.shape_cast %36 : vector<1x1x1x64x8xbf16> to vector<64x8xbf16>
    %c3 = arith.constant 3 : index
    %c0_32 = arith.constant 0 : index
    %c0_33 = arith.constant 0 : index
    %38 = vector.load %arg3[%c3, %c0_32, %c0_33] : memref<9x8x8xbf16, #tpu.memory_space<vmem>>, vector<1x8x8xbf16>
    %39 = vector.shape_cast %38 : vector<1x8x8xbf16> to vector<8x8xbf16>
    %cst_34 = arith.constant dense<0.000000e+00> : vector<64x8xf32>
    %40 = tpu.matmul %37, %39, %cst_34 {dimension_numbers = #tpu.dot_dimension_numbers<[1], [0], [0], [1], [0, 0, 1, 1], [], []>} : vector<64x8xbf16>, vector<8x8xbf16>, vector<64x8xf32> -> vector<64x8xf32>
    %41 = arith.addf %31, %40 : vector<64x8xf32>
    %c0_i32_35 = arith.constant 0 : i32
    %42 = arith.addi %0, %c0_i32_35 : i32
    %c8_i32_36 = arith.constant 8 : i32
    %43 = arith.muli %42, %c8_i32_36 : i32
    %44 = tpu.assume_multiple %43, 8 : i32
    %c0_37 = arith.constant 0 : index
    %c1_38 = arith.constant 1 : index
    %c1_39 = arith.constant 1 : index
    %45 = arith.index_cast %44 : i32 to index
    %c0_40 = arith.constant 0 : index
    %46 = vector.load %arg2[%c0_37, %c1_38, %c1_39, %45, %c0_40] : memref<1x3x2x72x8xbf16, #tpu.memory_space<vmem>>, vector<1x1x1x64x8xbf16>
    %47 = vector.shape_cast %46 : vector<1x1x1x64x8xbf16> to vector<64x8xbf16>
    %c4 = arith.constant 4 : index
    %c0_41 = arith.constant 0 : index
    %c0_42 = arith.constant 0 : index
    %48 = vector.load %arg3[%c4, %c0_41, %c0_42] : memref<9x8x8xbf16, #tpu.memory_space<vmem>>, vector<1x8x8xbf16>
    %49 = vector.shape_cast %48 : vector<1x8x8xbf16> to vector<8x8xbf16>
    %cst_43 = arith.constant dense<0.000000e+00> : vector<64x8xf32>
    %50 = tpu.matmul %47, %49, %cst_43 {dimension_numbers = #tpu.dot_dimension_numbers<[1], [0], [0], [1], [0, 0, 1, 1], [], []>} : vector<64x8xbf16>, vector<8x8xbf16>, vector<64x8xf32> -> vector<64x8xf32>
    %51 = arith.addf %41, %50 : vector<64x8xf32>
    %c0_i32_44 = arith.constant 0 : i32
    %52 = arith.addi %0, %c0_i32_44 : i32
    %c8_i32_45 = arith.constant 8 : i32
    %53 = arith.muli %52, %c8_i32_45 : i32
    %54 = tpu.assume_multiple %53, 8 : i32
    %c0_46 = arith.constant 0 : index
    %c2_47 = arith.constant 2 : index
    %c1_48 = arith.constant 1 : index
    %55 = arith.index_cast %54 : i32 to index
    %c0_49 = arith.constant 0 : index
    %56 = vector.load %arg2[%c0_46, %c2_47, %c1_48, %55, %c0_49] : memref<1x3x2x72x8xbf16, #tpu.memory_space<vmem>>, vector<1x1x1x64x8xbf16>
    %57 = vector.shape_cast %56 : vector<1x1x1x64x8xbf16> to vector<64x8xbf16>
    %c5 = arith.constant 5 : index
    %c0_50 = arith.constant 0 : index
    %c0_51 = arith.constant 0 : index
    %58 = vector.load %arg3[%c5, %c0_50, %c0_51] : memref<9x8x8xbf16, #tpu.memory_space<vmem>>, vector<1x8x8xbf16>
    %59 = vector.shape_cast %58 : vector<1x8x8xbf16> to vector<8x8xbf16>
    %cst_52 = arith.constant dense<0.000000e+00> : vector<64x8xf32>
    %60 = tpu.matmul %57, %59, %cst_52 {dimension_numbers = #tpu.dot_dimension_numbers<[1], [0], [0], [1], [0, 0, 1, 1], [], []>} : vector<64x8xbf16>, vector<8x8xbf16>, vector<64x8xf32> -> vector<64x8xf32>
    %61 = arith.addf %51, %60 : vector<64x8xf32>
    %c1_i32 = arith.constant 1 : i32
    %62 = arith.addi %0, %c1_i32 : i32
    %c8_i32_53 = arith.constant 8 : i32
    %63 = arith.muli %62, %c8_i32_53 : i32
    %64 = tpu.assume_multiple %63, 8 : i32
    %c0_54 = arith.constant 0 : index
    %c0_55 = arith.constant 0 : index
    %c0_56 = arith.constant 0 : index
    %65 = arith.index_cast %64 : i32 to index
    %c0_57 = arith.constant 0 : index
    %66 = vector.load %arg2[%c0_54, %c0_55, %c0_56, %65, %c0_57] : memref<1x3x2x72x8xbf16, #tpu.memory_space<vmem>>, vector<1x1x1x64x8xbf16>
    %67 = vector.shape_cast %66 : vector<1x1x1x64x8xbf16> to vector<64x8xbf16>
    %c6 = arith.constant 6 : index
    %c0_58 = arith.constant 0 : index
    %c0_59 = arith.constant 0 : index
    %68 = vector.load %arg3[%c6, %c0_58, %c0_59] : memref<9x8x8xbf16, #tpu.memory_space<vmem>>, vector<1x8x8xbf16>
    %69 = vector.shape_cast %68 : vector<1x8x8xbf16> to vector<8x8xbf16>
    %cst_60 = arith.constant dense<0.000000e+00> : vector<64x8xf32>
    %70 = tpu.matmul %67, %69, %cst_60 {dimension_numbers = #tpu.dot_dimension_numbers<[1], [0], [0], [1], [0, 0, 1, 1], [], []>} : vector<64x8xbf16>, vector<8x8xbf16>, vector<64x8xf32> -> vector<64x8xf32>
    %71 = arith.addf %61, %70 : vector<64x8xf32>
    %c1_i32_61 = arith.constant 1 : i32
    %72 = arith.addi %0, %c1_i32_61 : i32
    %c8_i32_62 = arith.constant 8 : i32
    %73 = arith.muli %72, %c8_i32_62 : i32
    %74 = tpu.assume_multiple %73, 8 : i32
    %c0_63 = arith.constant 0 : index
    %c1_64 = arith.constant 1 : index
    %c0_65 = arith.constant 0 : index
    %75 = arith.index_cast %74 : i32 to index
    %c0_66 = arith.constant 0 : index
    %76 = vector.load %arg2[%c0_63, %c1_64, %c0_65, %75, %c0_66] : memref<1x3x2x72x8xbf16, #tpu.memory_space<vmem>>, vector<1x1x1x64x8xbf16>
    %77 = vector.shape_cast %76 : vector<1x1x1x64x8xbf16> to vector<64x8xbf16>
    %c7 = arith.constant 7 : index
    %c0_67 = arith.constant 0 : index
    %c0_68 = arith.constant 0 : index
    %78 = vector.load %arg3[%c7, %c0_67, %c0_68] : memref<9x8x8xbf16, #tpu.memory_space<vmem>>, vector<1x8x8xbf16>
    %79 = vector.shape_cast %78 : vector<1x8x8xbf16> to vector<8x8xbf16>
    %cst_69 = arith.constant dense<0.000000e+00> : vector<64x8xf32>
    %80 = tpu.matmul %77, %79, %cst_69 {dimension_numbers = #tpu.dot_dimension_numbers<[1], [0], [0], [1], [0, 0, 1, 1], [], []>} : vector<64x8xbf16>, vector<8x8xbf16>, vector<64x8xf32> -> vector<64x8xf32>
    %81 = arith.addf %71, %80 : vector<64x8xf32>
    %c1_i32_70 = arith.constant 1 : i32
    %82 = arith.addi %0, %c1_i32_70 : i32
    %c8_i32_71 = arith.constant 8 : i32
    %83 = arith.muli %82, %c8_i32_71 : i32
    %84 = tpu.assume_multiple %83, 8 : i32
    %c0_72 = arith.constant 0 : index
    %c2_73 = arith.constant 2 : index
    %c0_74 = arith.constant 0 : index
    %85 = arith.index_cast %84 : i32 to index
    %c0_75 = arith.constant 0 : index
    %86 = vector.load %arg2[%c0_72, %c2_73, %c0_74, %85, %c0_75] : memref<1x3x2x72x8xbf16, #tpu.memory_space<vmem>>, vector<1x1x1x64x8xbf16>
    %87 = vector.shape_cast %86 : vector<1x1x1x64x8xbf16> to vector<64x8xbf16>
    %c8 = arith.constant 8 : index
    %c0_76 = arith.constant 0 : index
    %c0_77 = arith.constant 0 : index
    %88 = vector.load %arg3[%c8, %c0_76, %c0_77] : memref<9x8x8xbf16, #tpu.memory_space<vmem>>, vector<1x8x8xbf16>
    %89 = vector.shape_cast %88 : vector<1x8x8xbf16> to vector<8x8xbf16>
    %cst_78 = arith.constant dense<0.000000e+00> : vector<64x8xf32>
    %90 = tpu.matmul %87, %89, %cst_78 {dimension_numbers = #tpu.dot_dimension_numbers<[1], [0], [0], [1], [0, 0, 1, 1], [], []>} : vector<64x8xbf16>, vector<8x8xbf16>, vector<64x8xf32> -> vector<64x8xf32>
    %91 = arith.addf %81, %90 : vector<64x8xf32>
    %c0_79 = arith.constant 0 : index
    %c0_80 = arith.constant 0 : index
    %92 = vector.load %arg4[%c0_79, %c0_80] : memref<1x8xf32, #tpu.memory_space<vmem>>, vector<1x8xf32>
    %93 = vector.broadcast %92 : vector<1x8xf32> to vector<64x8xf32>
    %94 = arith.addf %91, %93 : vector<64x8xf32>
    %cst_81 = arith.constant 0.000000e+00 : f32
    %95 = vector.broadcast %cst_81 : f32 to vector<64x8xf32>
    %96 = arith.maximumf %94, %95 : vector<64x8xf32>
    %c0_82 = arith.constant 0 : index
    %c0_83 = arith.constant 0 : index
    %97 = vector.load %arg5[%c0_82, %c0_83] : memref<2x8xf32, #tpu.memory_space<vmem>>, vector<1x8xf32>
    %98 = vector.broadcast %97 : vector<1x8xf32> to vector<64x8xf32>
    %99 = arith.mulf %96, %98 : vector<64x8xf32>
    %c1_84 = arith.constant 1 : index
    %c0_85 = arith.constant 0 : index
    %100 = vector.load %arg5[%c1_84, %c0_85] : memref<2x8xf32, #tpu.memory_space<vmem>>, vector<1x8xf32>
    %101 = vector.broadcast %100 : vector<1x8xf32> to vector<64x8xf32>
    %102 = arith.addf %99, %101 : vector<64x8xf32>
    %103 = tpu.transpose %102, [1, 0] : vector<64x8xf32> -> vector<8x64xf32>
    %c0_86 = arith.constant 0 : index
    %c0_87 = arith.constant 0 : index
    %c0_88 = arith.constant 0 : index
    %104 = vector.load %arg6[%c0_86, %c0_87, %c0_88] : memref<1x8x64xf32, #tpu.memory_space<vmem>>, vector<1x8x64xf32>
    %105 = vector.shape_cast %104 : vector<1x8x64xf32> to vector<8x64xf32>
    %106 = vector.shape_cast %103 : vector<8x64xf32> to vector<1x8x64xf32>
    tpu.vector_store %arg6[%c0_86, %c0_87, %c0_88], %106 {strides = array<i32>} : memref<1x8x64xf32, #tpu.memory_space<vmem>>, vector<1x8x64xf32>,
    return
  }
  func.func @transform_0(%arg0: i32, %arg1: i32) -> (i32, i32, i32, i32, i32) {
    %c0_i32 = arith.constant 0 : i32
    %c0_i32_0 = arith.constant 0 : i32
    %c0_i32_1 = arith.constant 0 : i32
    %c0_i32_2 = arith.constant 0 : i32
    %c0_i32_3 = arith.constant 0 : i32
    return %arg0, %c0_i32, %c0_i32_0, %c0_i32_1, %c0_i32_2 : i32, i32, i32, i32, i32
  }
  func.func @transform_1(%arg0: i32, %arg1: i32) -> (i32, i32, i32) {
    %c0_i32 = arith.constant 0 : i32
    %c0_i32_0 = arith.constant 0 : i32
    %c0_i32_1 = arith.constant 0 : i32
    %c0_i32_2 = arith.constant 0 : i32
    return %c0_i32, %c0_i32_0, %c0_i32_1 : i32, i32, i32
  }
  func.func @transform_2(%arg0: i32, %arg1: i32) -> (i32, i32) {
    %c0_i32 = arith.constant 0 : i32
    %c0_i32_0 = arith.constant 0 : i32
    %c0_i32_1 = arith.constant 0 : i32
    return %c0_i32, %c0_i32_0 : i32, i32
  }
  func.func @transform_3(%arg0: i32, %arg1: i32) -> (i32, i32) {
    %c0_i32 = arith.constant 0 : i32
    %c0_i32_0 = arith.constant 0 : i32
    %c0_i32_1 = arith.constant 0 : i32
    return %c0_i32, %c0_i32_0 : i32, i32
  }
  func.func @transform_4(%arg0: i32, %arg1: i32) -> (i32, i32, i32) {
    %c0_i32 = arith.constant 0 : i32
    %c0_i32_0 = arith.constant 0 : i32
    return %arg0, %c0_i32, %arg1 : i32, i32, i32
  }
}

</mosaic_0001>

<bundles_post_ra>
// kernel: conv_layer_forward.3
= control target key start
LH: loop header
LB: loop body
LE: loop exit
PB: predicated region body
PF: predicated region fallthrough
CT: control target
= control target key end

     0   :  { %s1523_s15 = smov 0   ;;  %s1525_s16 = smov 0   ;;  %s1775_s0 = inlined_call_operand.vmem [shape: bf16[2,3,2,72,8], index: 0, kind: input, shape index: {}]   ;;  %s1776_s1 = inlined_call_operand.vmem [shape: bf16[9,8,8], index: 1, kind: input, shape index: {}]   ;;  %s1777_s2 = inlined_call_operand.vmem [shape: f32[1,8], index: 2, kind: input, shape index: {}]   ;;  %s1778_s3 = inlined_call_operand.vmem [shape: f32[2,8], index: 3, kind: input, shape index: {}]   ;;  %s1779_s4 = inlined_call_operand.vmem [shape: f32[2,8,64], index: 4, kind: output, shape index: {}]  }
   0x1   :  { %s1527_s17 = smov 0  }
   0x2 LB: > { %s26_s18 = sadd.s32 1, %s1492_s16  ;;  %p1147_p0 = scmp.ge.s32.totalorder %s1496_s17, 1  ;;  %s1496_s17 = sphi %s1527_s17, %s14_s17   ;;  %s1492_s16 = sphi %s1525_s16, %s1781_s16   ;;  %s1488_s15 = sphi %s1523_s15, %s1780_s15  }
   0x3   : > { %p28_p1 = scmp.ge.s32.totalorder %s26_s18, 2  ;;  %p176_p2 = scmp.lt.s32.totalorder %s1496_s17, 3 }
   0x5   : > { %s1783_s18 = smov (%p28_p1, %s26_s18), 0  ;;  %p177_p3 = pnand %p1147_p0, %p176_p2 }
   0x6   : > { %p204_p4 = scmp.lt.s32.totalorder (!%p177_p3), %s1488_s15, 1 }
   0x7   : > { %180 = sbr.rel (%p177_p3) target bundleno = 412 (0x19c), region = 36 }
   0xc   : > { %v1158_v0 = vld [vmem:[%s1776_s1 + $0x4] sm:$0xf]  ;;  %vm278_vm0 = vcmask 1043456   ;;  %v1207_v2 = vld [vmem:[%s1776_s1 + $0x8] sm:$0xf]  ;;  %s1785_s15 = smov (!%p204_p4, %s1488_s15), 1 }
   0xd   : > { %v280_v1 = vsel %vm278_vm0, %v1158_v0, 0  ;;  %v1236_v3 = vld [vmem:[%s1776_s1 + $0xc] sm:$0xf]  ;;  %v421_v4 = vsel %vm278_vm0, %v1207_v2, 0  ;;  %v231_v6 = vld [vmem:[%s1776_s1] sm:$0xf] }
   0xe   : > { %1442 = vmatpush.bf16.msra.mxu1 %v280_v1  ;;  %1443 = vmatpush.bf16.msra.mxu2 %v280_v1  ;;  %v506_v5 = vsel %vm278_vm0, %v1236_v3, 0  ;;  %v344_v7 = vsel %vm278_vm0, %v231_v6, 0  ;;  %v1265_v8 = vld [vmem:[%s1776_s1 + $0x10] sm:$0xf]  ;;  %s1445_s29 = smul.u32 216, %s1785_s15  ;;  %vm265_vm1 = vcmask 64512  }
   0xf   : > { %1444 = vmatpush.bf16.msra.mxu3 %v280_v1  ;;  %289 = vmatpush.bf16.msra.mxu0 %v280_v1  ;;  %v591_v9 = vsel %vm278_vm0, %v1265_v8, 0  ;;  %v1323_v10 = vld [vmem:[%s1776_s1 + $0x18] sm:$0xf]  ;;  %v1353_v11 = vld [vmem:[%s1776_s1 + $0x1c] sm:$0xf]  ;;  %s1149_s25 = sshll.u32 %s1785_s15, 3 }
  0x10   : > { %v1294_v12 = vld [vmem:[%s1776_s1 + $0x14] sm:$0xf]  ;;  %s1576_s12 = scalar_lea.vmem %s1775_s0, %s1445_s29  ;;  %v1383_v13 = vld [vmem:[%s1776_s1 + $0x20] sm:$0xf]  ;;  %v764_v18 = vsel %vm278_vm0, %v1323_v10, 0  ;;  %v849_v19 = vsel %vm278_vm0, %v1353_v11, 0  ;;  %s215_s28 = scalar_lea.vmem %s1779_s4, %s1149_s25 }
  0x11   : > { %v1411_v14 = vld [vmem:[%s1576_s12 + $0x50] sm:$0xff]  ;;  %v1412_v15 = vld [vmem:[%s1576_s12 + $0x58] sm:$0xff]  ;;  %v1413_v16 = vld [vmem:[%s1576_s12 + $0x60] sm:$0xff]  ;;  %v676_v20 = vsel %vm278_vm0, %v1294_v12, 0  ;;  %v934_v21 = vsel %vm278_vm0, %v1383_v13, 0  ;;  %vm1045_vm2 = vcmask 523264  }
  0x12   : > { %430 = vmatpush.bf16.msrb.mxu2 %v421_v4  ;;  %353 = vmatpush.bf16.msrb.mxu1 %v344_v7  ;;  %v1410_v17 = vld [vmem:[%s1576_s12 + $0x48] sm:$0xff]  ;;  %v1406_v22 = vld [vmem:[%s1576_s12] sm:$0xff]  ;;  %v1414_v23 = vld [vmem:[%s1576_s12 + $0x90] sm:$0xff] }
  0x13   : > { %515 = vmatpush.bf16.msrb.mxu3 %v506_v5  ;;  %600 = vmatpush.bf16.msrb.mxu0 %v591_v9  ;;  %v1418_v24 = vld [vmem:[%s1576_s12 + $0x24] sm:$0xff]  ;;  %v1422_v25 = vld [vmem:[%s1576_s12 + $0x6c] sm:$0xff]  ;;  %v1415_v27 = vld [vmem:[%s1576_s12 + $0x98] sm:$0xff] }
  0x14   : > { %1176 = vmatmul.msk.bf16.vlgmr.msra.gmra.mxu1 %vm265_vm1, %v1411_v14  ;;  %1177 = vmatmul.msk.bf16.vlgmr.msra.gmra.mxu2 %vm265_vm1, %v1412_v15  ;;  %v1407_v26 = vld [vmem:[%s1576_s12 + $0x8] sm:$0xff]  ;;  %v1423_v29 = vld [vmem:[%s1576_s12 + $0x74] sm:$0xff]  ;;  %v1416_v31 = vld [vmem:[%s1576_s12 + $0xa0] sm:$0xff] }
  0x15   : > { %1178 = vmatmul.msk.bf16.vlgmr.msra.gmra.mxu3 %vm265_vm1, %v1413_v16  ;;  %1175 = vmatmul.msk.bf16.vlgmr.msra.gmra.mxu0 %vm265_vm1, %v1410_v17  ;;  %v1419_v28 = vld [vmem:[%s1576_s12 + $0x2c] sm:$0xff]  ;;  %v1420_v32 = vld [vmem:[%s1576_s12 + $0x34] sm:$0xff]  ;;  %v1424_v33 = vld [vmem:[%s1576_s12 + $0x7c] sm:$0xff] }
  0x16   : > { %773 = vmatpush.bf16.msra.mxu2 %v764_v18  ;;  %685 = vmatpush.bf16.msra.mxu1 %v676_v20  ;;  %v1408_v30 = vld [vmem:[%s1576_s12 + $0x10] sm:$0xff]  ;;  %v1409_v34 = vld [vmem:[%s1576_s12 + $0x18] sm:$0xff]  ;;  %v1417_v35 = vld [vmem:[%s1576_s12 + $0xa8] sm:$0xff] }
  0x17   : > { %858 = vmatpush.bf16.msra.mxu3 %v849_v19  ;;  %943 = vmatpush.bf16.msra.mxu0 %v934_v21  ;;  %v1421_v36 = vld [vmem:[%s1576_s12 + $0x3c] sm:$0xff]  ;;  %v1425_v37 = vld [vmem:[%s1576_s12 + $0x84] sm:$0xff]  ;;  %v1426_v38 = vld [vmem:[%s1576_s12 + $0xb4] sm:$0xff] }
  0x18   : > { %v1430_v39 = vld [vmem:[%s1576_s12 + $0x4] sm:$0xff]  ;;  %v1434_v40 = vld [vmem:[%s1576_s12 + $0x4c] sm:$0xff]  ;;  %v1438_v41 = vld [vmem:[%s1576_s12 + $0x94] sm:$0xff] }
  0x19   : > { %v1427_v42 = vld [vmem:[%s1576_s12 + $0xbc] sm:$0xff]  ;;  %v1431_v43 = vld [vmem:[%s1576_s12 + $0xc] sm:$0xff]  ;;  %v1435_v44 = vld [vmem:[%s1576_s12 + $0x54] sm:$0xff] }
  0x1a   : > { %v1439_v45 = vld [vmem:[%s1576_s12 + $0x9c] sm:$0xff]  ;;  %v1428_v46 = vld [vmem:[%s1576_s12 + $0xc4] sm:$0xff]  ;;  %v1432_v47 = vld [vmem:[%s1576_s12 + $0x14] sm:$0xff] }
  0x1b   : > { %v1436_v48 = vld [vmem:[%s1576_s12 + $0x5c] sm:$0xff]  ;;  %v1440_v49 = vld [vmem:[%s1576_s12 + $0xa4] sm:$0xff]  ;;  %v1429_v50 = vld [vmem:[%s1576_s12 + $0xcc] sm:$0xff] }
  0x1c   : > { %v1433_v51 = vld [vmem:[%s1576_s12 + $0x1c] sm:$0xff]  ;;  %v1437_v53 = vld [vmem:[%s1576_s12 + $0x64] sm:$0xff]  ;;  %v1441_v54 = vld [vmem:[%s1576_s12 + $0xac] sm:$0xff] }
  0x24   : > { %1195 = vmatmul.msk.bf16.vlgmr.msrb.gmra.mxu1 %vm265_vm1, %v1406_v22  ;;  %1224 = vmatmul.msk.bf16.vlgmr.msrb.gmra.mxu2 %vm265_vm1, %v1414_v23 }
  0x25   : > { %1253 = vmatmul.msk.bf16.vlgmr.msrb.gmra.mxu3 %vm265_vm1, %v1418_v24  ;;  %1282 = vmatmul.msk.bf16.vlgmr.msrb.gmra.mxu0 %vm265_vm1, %v1422_v25 }
  0x34   : > { %1196 = vmatmul.msk.bf16.gmra.mxu1 %vm265_vm1, %v1407_v26  ;;  %1225 = vmatmul.msk.bf16.gmra.mxu2 %vm265_vm1, %v1415_v27 }
  0x35   : > { %1254 = vmatmul.msk.bf16.gmra.mxu3 %vm265_vm1, %v1419_v28  ;;  %1283 = vmatmul.msk.bf16.gmra.mxu0 %vm265_vm1, %v1423_v29 }
  0x44   : > { %1197 = vmatmul.msk.bf16.gmra.mxu1 %vm265_vm1, %v1408_v30  ;;  %1226 = vmatmul.msk.bf16.gmra.mxu2 %vm265_vm1, %v1416_v31 }
  0x45   : > { %1255 = vmatmul.msk.bf16.gmra.mxu3 %vm265_vm1, %v1420_v32  ;;  %1284 = vmatmul.msk.bf16.gmra.mxu0 %vm265_vm1, %v1424_v33 }
  0x54   : > { %1198 = vmatmul.msk.bf16.gmra.mxu1 %vm265_vm1, %v1409_v34  ;;  %1227 = vmatmul.msk.bf16.gmra.mxu2 %vm265_vm1, %v1417_v35 }
  0x55   : > { %1256 = vmatmul.msk.bf16.gmra.mxu3 %vm265_vm1, %v1421_v36  ;;  %1285 = vmatmul.msk.bf16.gmra.mxu0 %vm265_vm1, %v1425_v37 }
  0x64   : > { %1311 = vmatmul.msk.bf16.vlgmr.msra.gmra.mxu1 %vm265_vm1, %v1426_v38  ;;  %1340 = vmatmul.msk.bf16.vlgmr.msra.gmra.mxu2 %vm265_vm1, %v1430_v39 }
  0x65   : > { %1370 = vmatmul.msk.bf16.vlgmr.msra.gmra.mxu3 %vm265_vm1, %v1434_v40  ;;  %1400 = vmatmul.msk.bf16.vlgmr.msra.gmra.mxu0 %vm265_vm1, %v1438_v41 }
  0x74   : > { %1312 = vmatmul.msk.bf16.gmra.mxu1 %vm265_vm1, %v1427_v42  ;;  %1341 = vmatmul.msk.bf16.gmra.mxu2 %vm265_vm1, %v1431_v43 }
  0x75   : > { %1371 = vmatmul.msk.bf16.gmra.mxu3 %vm265_vm1, %v1435_v44  ;;  %1401 = vmatmul.msk.bf16.gmra.mxu0 %vm265_vm1, %v1439_v45 }
  0x84   : > { %1313 = vmatmul.msk.bf16.gmra.mxu1 %vm265_vm1, %v1428_v46  ;;  %1342 = vmatmul.msk.bf16.gmra.mxu2 %vm265_vm1, %v1432_v47  ;;  %v1704_v47 = vld [vmem:[%s1777_s2] ss:$0 sm:$0xff] }
  0x85   : > { %1372 = vmatmul.msk.bf16.gmra.mxu3 %vm265_vm1, %v1436_v48  ;;  %1402 = vmatmul.msk.bf16.gmra.mxu0 %vm265_vm1, %v1440_v49 }
  0x91   : > { %v296_v52 = vpop.f32.mrf.mxu1 }
  0x92   : > { %v291_v55 = vpop.f32.mrf.mxu0 }
  0x94   : > { %1314 = vmatmul.msk.bf16.gmra.mxu1 %vm265_vm1, %v1429_v50  ;;  %1343 = vmatmul.msk.bf16.gmra.mxu2 %vm265_vm1, %v1433_v51 }
  0x95   : > { %1373 = vmatmul.msk.bf16.gmra.mxu3 %vm265_vm1, %v1437_v53  ;;  %1403 = vmatmul.msk.bf16.gmra.mxu0 %vm265_vm1, %v1441_v54  ;;  %v1710_v54 = vld [vmem:[%s1778_s3] ss:$0 sm:$0xff] }
  0x97   : > { %v1657_v56 = vpop.f32.mrf.mxu2 }
  0x98   : > { %v1659_v57 = vpop.f32.mrf.mxu3 }
  0x99   : > { %v1661_v58 = vpop.f32.mrf.mxu1 }
  0x9a   : > { %v293_v59 = vpop.f32.mrf.mxu0 }
  0x9f   : > { %v1663_v60 = vpop.f32.mrf.mxu2 }
  0xa0   : > { %v1665_v61 = vpop.f32.mrf.mxu3 }
  0xa1   : > { %v355_v62 = vpop.f32.mrf.mxu1 }
  0xa2   : > { %v602_v63 = vpop.f32.mrf.mxu0  ;;  %v356_v27 = vadd.f32 %v355_v62, %v291_v55 }
  0xa7   : > { %v432_v0 = vpop.f32.mrf.mxu2 }
  0xa8   : > { %v517_v1 = vpop.f32.mrf.mxu3  ;;  %v452_v29 = vadd.f32 %v432_v0, %v356_v27  ;;  %v1715_v0 = vld [vmem:[%s1778_s3 + $0x1] ss:$0 sm:$0xff] }
  0xa9   : > { %v357_v2 = vpop.f32.mrf.mxu1 }
  0xaa   : > { %v604_v3 = vpop.f32.mrf.mxu0  ;;  %v537_v31 = vadd.f32 %v517_v1, %v452_v29  ;;  %v358_v34 = vadd.f32 %v357_v2, %v293_v59 }
  0xac   : > { %v622_v37 = vadd.f32 %v602_v63, %v537_v31 }
  0xaf   : > { %v434_v4 = vpop.f32.mrf.mxu2 }
  0xb0   : > { %v519_v5 = vpop.f32.mrf.mxu3  ;;  %v453_v36 = vadd.f32 %v434_v4, %v358_v34 }
  0xb1   : > { %v360_v6 = vpop.f32.mrf.mxu1 }
  0xb2   : > { %v607_v7 = vpop.f32.mrf.mxu0  ;;  %v538_v40 = vadd.f32 %v519_v5, %v453_v36  ;;  %v361_v44 = vadd.f32 %v360_v6, %v296_v52 }
  0xb4   : > { %v623_v50 = vadd.f32 %v604_v3, %v538_v40 }
  0xb7   : > { %v437_v8 = vpop.f32.mrf.mxu2 }
  0xb8   : > { %v522_v9 = vpop.f32.mrf.mxu3  ;;  %v454_v48 = vadd.f32 %v437_v8, %v361_v44 }
  0xb9   : > { %v362_v10 = vpop.f32.mrf.mxu1 }
  0xba   : > { %v1667_v11 = vpop.f32.mrf.mxu0  ;;  %v539_v52 = vadd.f32 %v522_v9, %v454_v48  ;;  %v363_v2 = vadd.f32 %v362_v10, %v1661_v58 }
  0xbc   : > { %v624_v27 = vadd.f32 %v607_v7, %v539_v52 }
  0xbf   : > { %v439_v12 = vpop.f32.mrf.mxu2 }
  0xc0   : > { %v524_v13 = vpop.f32.mrf.mxu3  ;;  %v455_v6 = vadd.f32 %v439_v12, %v363_v2 }
  0xc1   : > { %v1669_v14 = vpop.f32.mrf.mxu1 }
  0xc2   : > { %v1671_v15 = vpop.f32.mrf.mxu0  ;;  %v540_v34 = vadd.f32 %v524_v13, %v455_v6  ;;  %v366_v58 = vadd.f32 %v1669_v14, %v1657_v56 }
  0xc7   : > { %v1673_v16 = vpop.f32.mrf.mxu2 }
  0xc8   : > { %v1675_v17 = vpop.f32.mrf.mxu3  ;;  %v456_v7 = vadd.f32 %v1673_v16, %v366_v58 }
  0xc9   : > { %v1677_v18 = vpop.f32.mrf.mxu1 }
  0xca   : > { %v1679_v19 = vpop.f32.mrf.mxu0 }
  0xcf   : > { %v1681_v20 = vpop.f32.mrf.mxu2 }
  0xd0   : > { %v1683_v21 = vpop.f32.mrf.mxu3 }
  0xd1   : > { %v1685_v22 = vpop.f32.mrf.mxu1 }
  0xd2   : > { %v1687_v23 = vpop.f32.mrf.mxu0 }
  0xd7   : > { %v1689_v24 = vpop.f32.mrf.mxu2 }
  0xd8   : > { %v1691_v25 = vpop.f32.mrf.mxu3 }
  0xd9   : > { %v1693_v26 = vpop.f32.mrf.mxu1 }
  0xda   : > { %v1695_v28 = vpop.f32.mrf.mxu0 }
  0xdf   : > { %v1697_v30 = vpop.f32.mrf.mxu2 }
  0xe0   : > { %v1699_v32 = vpop.f32.mrf.mxu3 }
  0xe1   : > { %v687_v33 = vpop.f32.mrf.mxu1 }
  0xe2   : > { %v945_v35 = vpop.f32.mrf.mxu0  ;;  %v707_v38 = vadd.f32 %v687_v33, %v622_v37 }
  0xe7   : > { %v775_v39 = vpop.f32.mrf.mxu2 }
  0xe8   : > { %v795_v41 = vadd.f32 %v775_v39, %v707_v38  ;;  %v860_v42 = vpop.f32.mrf.mxu3 }
  0xe9   : > { %v689_v43 = vpop.f32.mrf.mxu1 }
  0xea   : > { %v880_v45 = vadd.f32 %v860_v42, %v795_v41  ;;  %v947_v46 = vpop.f32.mrf.mxu0  ;;  %v708_v51 = vadd.f32 %v689_v43, %v623_v50  ;;  %v625_v41 = vadd.f32 %v1667_v11, %v540_v34 }
  0xec   : > { %v965_v49 = vadd.f32 %v945_v35, %v880_v45  ;;  %v541_v45 = vadd.f32 %v1675_v17, %v456_v7 }
  0xee   : > { %v977_v53 = vadd.f32 %v1704_v47, %v965_v49  ;;  %v368_v49 = vadd.f32 %v1677_v18, %v1663_v60 }
  0xef   : > { %v777_v55 = vpop.f32.mrf.mxu2 }
  0xf0   : > { %v796_v59 = vadd.f32 %v777_v55, %v708_v51  ;;  %v862_v62 = vpop.f32.mrf.mxu3  ;;  %v985_v63 = vmax.f32 %v977_v53, 0.0  ;;  %v457_v11 = vadd.f32 %v1681_v20, %v368_v49  ;;  %v626_v53 = vadd.f32 %v1671_v15, %v541_v45 }
  0xf1   : > { %v692_v1 = vpop.f32.mrf.mxu1  ;;  %v371_v20 = vadd.f32 %v1685_v22, %v1659_v57 }
  0xf2   : > { %v881_v3 = vadd.f32 %v862_v62, %v796_v59  ;;  %v950_v4 = vpop.f32.mrf.mxu0  ;;  %v995_v5 = vmul.f32 %v1710_v54, %v985_v63  ;;  %v709_v31 = vadd.f32 %v692_v1, %v624_v27  ;;  %v542_v63 = vadd.f32 %v1683_v21, %v457_v11 }
  0xf4   : > { %v966_v8 = vadd.f32 %v947_v46, %v881_v3  ;;  %v1005_v9 = vadd.f32 %v1715_v0, %v995_v5  ;;  %v627_v6 = vadd.f32 %v1679_v19, %v542_v63 }
  0xf6   : > { %v978_v29 = vadd.f32 %v1704_v47, %v966_v8  ;;  %1013 = vxpose.xlu0.b32.start [1/8] (short) (narrow) %v1005_v9, 8 }
  0xf7   : > { %v780_v33 = vpop.f32.mrf.mxu2 }
  0xf8   : > { %v986_v35 = vmax.f32 %v978_v29, 0.0  ;;  %v797_v36 = vadd.f32 %v780_v33, %v709_v31  ;;  %v865_v37 = vpop.f32.mrf.mxu3 }
  0xf9   : > { %v694_v38 = vpop.f32.mrf.mxu1 }
  0xfa   : > { %v882_v10 = vadd.f32 %v865_v37, %v797_v36  ;;  %v996_v12 = vmul.f32 %v1710_v54, %v986_v35  ;;  %v952_v39 = vpop.f32.mrf.mxu0  ;;  %v710_v43 = vadd.f32 %v694_v38, %v625_v41 }
  0xfc   : > { %v967_v40 = vadd.f32 %v950_v4, %v882_v10  ;;  %v1006_v42 = vadd.f32 %v1715_v0, %v996_v12  ;;  %v458_v4 = vadd.f32 %v1689_v24, %v371_v20  ;;  %v373_v24 = vadd.f32 %v1693_v26, %v1665_v61 }
  0xfe   : > { %v979_v13 = vadd.f32 %v1704_v47, %v967_v40  ;;  %1014 = vxpose.xlu0.b32.cont [2/8] (short) (narrow) %v1006_v42, 8  ;;  %v543_v31 = vadd.f32 %v1691_v25, %v458_v4  ;;  %v459_v36 = vadd.f32 %v1697_v30, %v373_v24 }
  0xff   : > { %v782_v44 = vpop.f32.mrf.mxu2 }
 0x100   : > { %v987_v46 = vmax.f32 %v979_v13, 0.0  ;;  %v798_v56 = vadd.f32 %v782_v44, %v710_v43  ;;  %v867_v14 = vpop.f32.mrf.mxu3  ;;  %v628_v38 = vadd.f32 %v1687_v23, %v543_v31 }
 0x101   : > { %v697_v48 = vpop.f32.mrf.mxu1 }
 0x102   : > { %v883_v16 = vadd.f32 %v867_v14, %v798_v56  ;;  %v997_v50 = vmul.f32 %v1710_v54, %v987_v46  ;;  %v955_v52 = vpop.f32.mrf.mxu0  ;;  %v711_v59 = vadd.f32 %v697_v48, %v626_v53 }
 0x104   : > { %v968_v51 = vadd.f32 %v952_v39, %v883_v16  ;;  %v1007_v55 = vadd.f32 %v1715_v0, %v997_v50  ;;  %v544_v39 = vadd.f32 %v1699_v32, %v459_v36 }
 0x106   : > { %v980_v17 = vadd.f32 %v1704_v47, %v968_v51  ;;  %1015 = vxpose.xlu0.b32.cont [3/8] (short) (narrow) %v1007_v55, 8  ;;  %v629_v23 = vadd.f32 %v1695_v28, %v544_v39 }
 0x107   : > { %v785_v62 = vpop.f32.mrf.mxu2 }
 0x108   : > { %v988_v1 = vmax.f32 %v980_v17, 0.0  ;;  %v799_v60 = vadd.f32 %v785_v62, %v711_v59  ;;  %v870_v18 = vpop.f32.mrf.mxu3 }
 0x109   : > { %v699_v2 = vpop.f32.mrf.mxu1 }
 0x10a   : > { %v884_v3 = vadd.f32 %v870_v18, %v799_v60  ;;  %v998_v15 = vmul.f32 %v1710_v54, %v988_v1  ;;  %v712_v21 = vadd.f32 %v699_v2, %v627_v6  ;;  %v957_v9 = vpop.f32.mrf.mxu0 }
 0x10c   : > { %v969_v5 = vadd.f32 %v955_v52, %v884_v3  ;;  %v1008_v8 = vadd.f32 %v1715_v0, %v998_v15 }
 0x10e   : > { %v981_v27 = vadd.f32 %v1704_v47, %v969_v5  ;;  %1016 = vxpose.xlu0.b32.cont [4/8] (short) (narrow) %v1008_v8, 8 }
 0x10f   : > { %v787_v29 = vpop.f32.mrf.mxu2 }
 0x110   : > { %v989_v33 = vmax.f32 %v981_v27, 0.0  ;;  %v800_v57 = vadd.f32 %v787_v29, %v712_v21  ;;  %v872_v22 = vpop.f32.mrf.mxu3 }
 0x111   : > { %v702_v34 = vpop.f32.mrf.mxu1 }
 0x112   : > { %v885_v35 = vadd.f32 %v872_v22, %v800_v57  ;;  %v999_v19 = vmul.f32 %v1710_v54, %v989_v33  ;;  %v713_v25 = vadd.f32 %v702_v34, %v628_v38  ;;  %v960_v26 = vpop.f32.mrf.mxu0 }
 0x114   : > { %v970_v37 = vadd.f32 %v957_v9, %v885_v35  ;;  %v1009_v58 = vadd.f32 %v1715_v0, %v999_v19 }
 0x116   : > { %v982_v10 = vadd.f32 %v1704_v47, %v970_v37  ;;  %1017 = vxpose.xlu0.b32.cont [5/8] (short) (narrow) %v1009_v58, 8 }
 0x117   : > { %v790_v12 = vpop.f32.mrf.mxu2 }
 0x118   : > { %v990_v7 = vmax.f32 %v982_v10, 0.0  ;;  %v801_v40 = vadd.f32 %v790_v12, %v713_v25  ;;  %v875_v61 = vpop.f32.mrf.mxu3 }
 0x119   : > { %v704_v30 = vpop.f32.mrf.mxu1 }
 0x11a   : > { %v886_v41 = vadd.f32 %v875_v61, %v801_v40  ;;  %v1000_v42 = vmul.f32 %v1710_v54, %v990_v7  ;;  %v714_v45 = vadd.f32 %v704_v30, %v629_v23  ;;  %v962_v16 = vpop.f32.mrf.mxu0 }
 0x11c   : > { %v971_v13 = vadd.f32 %v960_v26, %v886_v41  ;;  %v1010_v43 = vadd.f32 %v1715_v0, %v1000_v42 }
 0x11e   : > { %v983_v44 = vadd.f32 %v1704_v47, %v971_v13  ;;  %1018 = vxpose.xlu0.b32.cont [6/8] (short) (narrow) %v1010_v43, 8 }
 0x11f   : > { %v792_v46 = vpop.f32.mrf.mxu2 }
 0x120   : > { %v991_v32 = vmax.f32 %v983_v44, 0.0  ;;  %v802_v56 = vadd.f32 %v792_v46, %v714_v45  ;;  %v877_v14 = vpop.f32.mrf.mxu3 }
 0x122   : > { %v887_v48 = vadd.f32 %v877_v14, %v802_v56  ;;  %v1001_v49 = vmul.f32 %v1710_v54, %v991_v32 }
 0x124   : > { %v972_v50 = vadd.f32 %v962_v16, %v887_v48  ;;  %v1011_v11 = vadd.f32 %v1715_v0, %v1001_v49 }
 0x126   : > { %v984_v28 = vadd.f32 %v1704_v47, %v972_v50  ;;  %1019 = vxpose.xlu0.b32.cont [7/8] (short) (narrow) %v1011_v11, 8 }
 0x128   : > { %v992_v51 = vmax.f32 %v984_v28, 0.0 }
 0x12a   : > { %v1002_v53 = vmul.f32 %v1710_v54, %v992_v51 }
 0x12c   : > { %v1012_v55 = vadd.f32 %v1715_v0, %v1002_v53 }
 0x12e   : > { %1020 = vxpose.xlu0.b32.end [8/8] (short) (narrow) %v1012_v55, 8 }
 0x19a   : > { %v1029_v52 = vpop.trf.xlu0 }
 0x19b   : > { %1046 = vst.msk [vmem:[%s215_s28] sm:$0xff] %vm1045_vm2, %v1029_v52 }
 0x19c PF: > { %s14_s17 = sadd.s32 1, %s1496_s17   ;;  %s1780_s15 = smov %s1492_s16 }
 0x19d   : > { %p11_p5 = scmp.ge.s32.totalorder %s14_s17, 4   ;;  %s1781_s16 = smov %s1783_s18 }
 0x19f   :  { %13 = sbr.rel (!%p11_p5) target bundleno = 2 (0x2), region = 83 }

// kernel: conv_layer_forward.2
= control target key start
LH: loop header
LB: loop body
LE: loop exit
PB: predicated region body
PF: predicated region fallthrough
CT: control target
= control target key end

     0   :  { %s1499_s12 = smov 0   ;;  %s1501_s13 = smov 0   ;;  %s1727_s0 = inlined_call_operand.vmem [shape: bf16[2,3,2,72,8], index: 0, kind: input, shape index: {}]   ;;  %s1728_s1 = inlined_call_operand.vmem [shape: bf16[9,8,8], index: 1, kind: input, shape index: {}]   ;;  %s1729_s2 = inlined_call_operand.vmem [shape: f32[1,8], index: 2, kind: input, shape index: {}]   ;;  %s1730_s3 = inlined_call_operand.vmem [shape: f32[2,1,2,8], index: 3, kind: output, shape index: {}]  }
   0x1   :  { %s1503_s14 = smov 0  }
   0x2 LB: > { %s25_s15 = sadd.s32 1, %s1473_s13  ;;  %p1131_p0 = scmp.ge.s32.totalorder %s1477_s14, 1  ;;  %s1477_s14 = sphi %s1503_s14, %s13_s14   ;;  %s1473_s13 = sphi %s1501_s13, %s1732_s13   ;;  %s1469_s12 = sphi %s1499_s12, %s1731_s12  }
   0x3   : > { %p27_p1 = scmp.ge.s32.totalorder %s25_s15, 2  ;;  %p151_p2 = scmp.lt.s32.totalorder %s1477_s14, 3 }
   0x5   : > { %s1734_s15 = smov (%p27_p1, %s25_s15), 0  ;;  %p152_p3 = pnand %p1131_p0, %p151_p2 }
   0x6   : > { %p177_p4 = scmp.lt.s32.totalorder (!%p152_p3), %s1469_s12, 1 }
   0x7   : > { %155 = sbr.rel (%p152_p3) target bundleno = 318 (0x13e), region = 32 }
   0xc   : > { %v1142_v0 = vld [vmem:[%s1728_s1 + $0x4] sm:$0xf]  ;;  %vm251_vm0 = vcmask 1043456   ;;  %v1191_v2 = vld [vmem:[%s1728_s1 + $0x8] sm:$0xf]  ;;  %s1736_s12 = smov (!%p177_p4, %s1469_s12), 1 }
   0xd   : > { %v253_v1 = vsel %vm251_vm0, %v1142_v0, 0  ;;  %v1220_v3 = vld [vmem:[%s1728_s1 + $0xc] sm:$0xf]  ;;  %v394_v4 = vsel %vm251_vm0, %v1191_v2, 0  ;;  %v204_v6 = vld [vmem:[%s1728_s1] sm:$0xf] }
   0xe   : > { %1426 = vmatpush.bf16.msra.mxu1 %v253_v1  ;;  %1427 = vmatpush.bf16.msra.mxu2 %v253_v1  ;;  %v479_v5 = vsel %vm251_vm0, %v1220_v3, 0  ;;  %v317_v7 = vsel %vm251_vm0, %v204_v6, 0  ;;  %v1249_v8 = vld [vmem:[%s1728_s1 + $0x10] sm:$0xf]  ;;  %s1429_s26 = smul.u32 216, %s1736_s12  ;;  %vm238_vm1 = vcmask 64512  }
   0xf   : > { %1428 = vmatpush.bf16.msra.mxu3 %v253_v1  ;;  %262 = vmatpush.bf16.msra.mxu0 %v253_v1  ;;  %v564_v9 = vsel %vm251_vm0, %v1249_v8, 0  ;;  %v1307_v10 = vld [vmem:[%s1728_s1 + $0x18] sm:$0xf]  ;;  %v1337_v11 = vld [vmem:[%s1728_s1 + $0x1c] sm:$0xf]  ;;  %s1133_s19 = sshll.u32 %s1736_s12, 1 }
  0x10   : > { %s1549_s6 = scalar_lea.vmem %s1727_s0, %s1429_s26  ;;  %v1278_v12 = vld [vmem:[%s1728_s1 + $0x14] sm:$0xf]  ;;  %v1367_v13 = vld [vmem:[%s1728_s1 + $0x20] sm:$0xf]  ;;  %v737_v18 = vsel %vm251_vm0, %v1307_v10, 0  ;;  %v822_v19 = vsel %vm251_vm0, %v1337_v11, 0  ;;  %s188_s22 = scalar_lea.vmem %s1730_s3, %s1133_s19 }
  0x11   : > { %v1395_v14 = vld [vmem:[%s1549_s6 + $0x50] sm:$0xff]  ;;  %v1396_v15 = vld [vmem:[%s1549_s6 + $0x58] sm:$0xff]  ;;  %v1397_v16 = vld [vmem:[%s1549_s6 + $0x60] sm:$0xff]  ;;  %v649_v20 = vsel %vm251_vm0, %v1278_v12, 0  ;;  %v907_v21 = vsel %vm251_vm0, %v1367_v13, 0  ;;  %vm999_vm2 = vcmask 57344  }
  0x12   : > { %403 = vmatpush.bf16.msrb.mxu2 %v394_v4  ;;  %326 = vmatpush.bf16.msrb.mxu1 %v317_v7  ;;  %v1394_v17 = vld [vmem:[%s1549_s6 + $0x48] sm:$0xff]  ;;  %v1390_v22 = vld [vmem:[%s1549_s6] sm:$0xff]  ;;  %v1398_v23 = vld [vmem:[%s1549_s6 + $0x90] sm:$0xff] }
  0x13   : > { %488 = vmatpush.bf16.msrb.mxu3 %v479_v5  ;;  %573 = vmatpush.bf16.msrb.mxu0 %v564_v9  ;;  %v1402_v24 = vld [vmem:[%s1549_s6 + $0x24] sm:$0xff]  ;;  %v1406_v25 = vld [vmem:[%s1549_s6 + $0x6c] sm:$0xff]  ;;  %v1399_v27 = vld [vmem:[%s1549_s6 + $0x98] sm:$0xff] }
  0x14   : > { %1160 = vmatmul.msk.bf16.vlgmr.msra.gmra.mxu1 %vm238_vm1, %v1395_v14  ;;  %1161 = vmatmul.msk.bf16.vlgmr.msra.gmra.mxu2 %vm238_vm1, %v1396_v15  ;;  %v1391_v26 = vld [vmem:[%s1549_s6 + $0x8] sm:$0xff]  ;;  %v1407_v29 = vld [vmem:[%s1549_s6 + $0x74] sm:$0xff]  ;;  %v1400_v31 = vld [vmem:[%s1549_s6 + $0xa0] sm:$0xff] }
  0x15   : > { %1162 = vmatmul.msk.bf16.vlgmr.msra.gmra.mxu3 %vm238_vm1, %v1397_v16  ;;  %1159 = vmatmul.msk.bf16.vlgmr.msra.gmra.mxu0 %vm238_vm1, %v1394_v17  ;;  %v1403_v28 = vld [vmem:[%s1549_s6 + $0x2c] sm:$0xff]  ;;  %v1404_v32 = vld [vmem:[%s1549_s6 + $0x34] sm:$0xff]  ;;  %v1408_v33 = vld [vmem:[%s1549_s6 + $0x7c] sm:$0xff] }
  0x16   : > { %746 = vmatpush.bf16.msra.mxu2 %v737_v18  ;;  %658 = vmatpush.bf16.msra.mxu1 %v649_v20  ;;  %v1392_v30 = vld [vmem:[%s1549_s6 + $0x10] sm:$0xff]  ;;  %v1393_v34 = vld [vmem:[%s1549_s6 + $0x18] sm:$0xff]  ;;  %v1401_v35 = vld [vmem:[%s1549_s6 + $0xa8] sm:$0xff] }
  0x17   : > { %831 = vmatpush.bf16.msra.mxu3 %v822_v19  ;;  %916 = vmatpush.bf16.msra.mxu0 %v907_v21  ;;  %v1405_v36 = vld [vmem:[%s1549_s6 + $0x3c] sm:$0xff]  ;;  %v1409_v37 = vld [vmem:[%s1549_s6 + $0x84] sm:$0xff]  ;;  %v1410_v38 = vld [vmem:[%s1549_s6 + $0xb4] sm:$0xff] }
  0x18   : > { %v1414_v39 = vld [vmem:[%s1549_s6 + $0x4] sm:$0xff]  ;;  %v1418_v40 = vld [vmem:[%s1549_s6 + $0x4c] sm:$0xff]  ;;  %v1422_v41 = vld [vmem:[%s1549_s6 + $0x94] sm:$0xff] }
  0x19   : > { %v1411_v42 = vld [vmem:[%s1549_s6 + $0xbc] sm:$0xff]  ;;  %v1415_v43 = vld [vmem:[%s1549_s6 + $0xc] sm:$0xff]  ;;  %v1419_v44 = vld [vmem:[%s1549_s6 + $0x54] sm:$0xff] }
  0x1a   : > { %v1423_v45 = vld [vmem:[%s1549_s6 + $0x9c] sm:$0xff]  ;;  %v1412_v46 = vld [vmem:[%s1549_s6 + $0xc4] sm:$0xff]  ;;  %v1416_v47 = vld [vmem:[%s1549_s6 + $0x14] sm:$0xff] }
  0x1b   : > { %v1420_v48 = vld [vmem:[%s1549_s6 + $0x5c] sm:$0xff]  ;;  %v1424_v49 = vld [vmem:[%s1549_s6 + $0xa4] sm:$0xff]  ;;  %v1413_v50 = vld [vmem:[%s1549_s6 + $0xcc] sm:$0xff] }
  0x1c   : > { %v1417_v51 = vld [vmem:[%s1549_s6 + $0x1c] sm:$0xff]  ;;  %v1421_v53 = vld [vmem:[%s1549_s6 + $0x64] sm:$0xff]  ;;  %v1425_v54 = vld [vmem:[%s1549_s6 + $0xac] sm:$0xff] }
  0x24   : > { %1179 = vmatmul.msk.bf16.vlgmr.msrb.gmra.mxu1 %vm238_vm1, %v1390_v22  ;;  %1208 = vmatmul.msk.bf16.vlgmr.msrb.gmra.mxu2 %vm238_vm1, %v1398_v23 }
  0x25   : > { %1237 = vmatmul.msk.bf16.vlgmr.msrb.gmra.mxu3 %vm238_vm1, %v1402_v24  ;;  %1266 = vmatmul.msk.bf16.vlgmr.msrb.gmra.mxu0 %vm238_vm1, %v1406_v25 }
  0x34   : > { %1180 = vmatmul.msk.bf16.gmra.mxu1 %vm238_vm1, %v1391_v26  ;;  %1209 = vmatmul.msk.bf16.gmra.mxu2 %vm238_vm1, %v1399_v27 }
  0x35   : > { %1238 = vmatmul.msk.bf16.gmra.mxu3 %vm238_vm1, %v1403_v28  ;;  %1267 = vmatmul.msk.bf16.gmra.mxu0 %vm238_vm1, %v1407_v29 }
  0x44   : > { %1181 = vmatmul.msk.bf16.gmra.mxu1 %vm238_vm1, %v1392_v30  ;;  %1210 = vmatmul.msk.bf16.gmra.mxu2 %vm238_vm1, %v1400_v31 }
  0x45   : > { %1239 = vmatmul.msk.bf16.gmra.mxu3 %vm238_vm1, %v1404_v32  ;;  %1268 = vmatmul.msk.bf16.gmra.mxu0 %vm238_vm1, %v1408_v33 }
  0x54   : > { %1182 = vmatmul.msk.bf16.gmra.mxu1 %vm238_vm1, %v1393_v34  ;;  %1211 = vmatmul.msk.bf16.gmra.mxu2 %vm238_vm1, %v1401_v35 }
  0x55   : > { %1240 = vmatmul.msk.bf16.gmra.mxu3 %vm238_vm1, %v1405_v36  ;;  %1269 = vmatmul.msk.bf16.gmra.mxu0 %vm238_vm1, %v1409_v37 }
  0x64   : > { %1295 = vmatmul.msk.bf16.vlgmr.msra.gmra.mxu1 %vm238_vm1, %v1410_v38  ;;  %1324 = vmatmul.msk.bf16.vlgmr.msra.gmra.mxu2 %vm238_vm1, %v1414_v39 }
  0x65   : > { %1354 = vmatmul.msk.bf16.vlgmr.msra.gmra.mxu3 %vm238_vm1, %v1418_v40  ;;  %1384 = vmatmul.msk.bf16.vlgmr.msra.gmra.mxu0 %vm238_vm1, %v1422_v41 }
  0x74   : > { %1296 = vmatmul.msk.bf16.gmra.mxu1 %vm238_vm1, %v1411_v42  ;;  %1325 = vmatmul.msk.bf16.gmra.mxu2 %vm238_vm1, %v1415_v43 }
  0x75   : > { %1355 = vmatmul.msk.bf16.gmra.mxu3 %vm238_vm1, %v1419_v44  ;;  %1385 = vmatmul.msk.bf16.gmra.mxu0 %vm238_vm1, %v1423_v45 }
  0x84   : > { %1297 = vmatmul.msk.bf16.gmra.mxu1 %vm238_vm1, %v1412_v46  ;;  %1326 = vmatmul.msk.bf16.gmra.mxu2 %vm238_vm1, %v1416_v47 }
  0x85   : > { %1356 = vmatmul.msk.bf16.gmra.mxu3 %vm238_vm1, %v1420_v48  ;;  %1386 = vmatmul.msk.bf16.gmra.mxu0 %vm238_vm1, %v1424_v49 }
  0x91   : > { %v269_v52 = vpop.f32.mrf.mxu1 }
  0x92   : > { %v264_v55 = vpop.f32.mrf.mxu0 }
  0x94   : > { %1298 = vmatmul.msk.bf16.gmra.mxu1 %vm238_vm1, %v1413_v50  ;;  %1327 = vmatmul.msk.bf16.gmra.mxu2 %vm238_vm1, %v1417_v51 }
  0x95   : > { %1357 = vmatmul.msk.bf16.gmra.mxu3 %vm238_vm1, %v1421_v53  ;;  %1387 = vmatmul.msk.bf16.gmra.mxu0 %vm238_vm1, %v1425_v54 }
  0x97   : > { %v274_v56 = vpop.f32.mrf.mxu2 }
  0x98   : > { %v1633_v57 = vpop.f32.mrf.mxu3 }
  0x99   : > { %v271_v58 = vpop.f32.mrf.mxu1 }
  0x9a   : > { %v266_v59 = vpop.f32.mrf.mxu0 }
  0x9f   : > { %v276_v60 = vpop.f32.mrf.mxu2 }
  0xa0   : > { %v1635_v61 = vpop.f32.mrf.mxu3 }
  0xa1   : > { %v328_v62 = vpop.f32.mrf.mxu1 }
  0xa2   : > { %v329_v63 = vadd.f32 %v328_v62, %v264_v55  ;;  %v575_v0 = vpop.f32.mrf.mxu0 }
  0xa7   : > { %v405_v1 = vpop.f32.mrf.mxu2 }
  0xa8   : > { %v425_v2 = vadd.f32 %v405_v1, %v329_v63  ;;  %v490_v3 = vpop.f32.mrf.mxu3 }
  0xa9   : > { %v330_v4 = vpop.f32.mrf.mxu1 }
  0xaa   : > { %v510_v5 = vadd.f32 %v490_v3, %v425_v2  ;;  %v331_v6 = vadd.f32 %v330_v4, %v266_v59  ;;  %v577_v7 = vpop.f32.mrf.mxu0  ;;  %v946_v2 = vld [vmem:[%s1729_s2] sm:$0x1] }
  0xac   : > { %v595_v8 = vadd.f32 %v575_v0, %v510_v5  ;;  %v1662_v0 = vld [vmem:[%s1729_s2] ss:$0 sm:$0xff]  ;;  %v966_v5 = vmax.f32 %v946_v2, 0.0 }
  0xaf   : > { %v407_v9 = vpop.f32.mrf.mxu2 }
  0xb0   : > { %v426_v10 = vadd.f32 %v407_v9, %v331_v6  ;;  %v492_v11 = vpop.f32.mrf.mxu3 }
  0xb1   : > { %v333_v12 = vpop.f32.mrf.mxu1 }
  0xb2   : > { %v511_v13 = vadd.f32 %v492_v11, %v426_v10  ;;  %v334_v14 = vadd.f32 %v333_v12, %v269_v52  ;;  %v580_v15 = vpop.f32.mrf.mxu0  ;;  %v1668_v12 = vperm.slane %v966_v5, 0 }
  0xb4   : > { %v596_v16 = vadd.f32 %v577_v7, %v511_v13 }
  0xb7   : > { %v410_v17 = vpop.f32.mrf.mxu2 }
  0xb8   : > { %v427_v18 = vadd.f32 %v410_v17, %v334_v14  ;;  %v495_v19 = vpop.f32.mrf.mxu3 }
  0xb9   : > { %v335_v20 = vpop.f32.mrf.mxu1 }
  0xba   : > { %v512_v21 = vadd.f32 %v495_v19, %v427_v18  ;;  %v336_v22 = vadd.f32 %v335_v20, %v271_v58  ;;  %v582_v23 = vpop.f32.mrf.mxu0 }
  0xbc   : > { %v597_v24 = vadd.f32 %v580_v15, %v512_v21 }
  0xbf   : > { %v412_v25 = vpop.f32.mrf.mxu2 }
  0xc0   : > { %v428_v26 = vadd.f32 %v412_v25, %v336_v22  ;;  %v497_v27 = vpop.f32.mrf.mxu3 }
  0xc1   : > { %v338_v28 = vpop.f32.mrf.mxu1 }
  0xc2   : > { %v513_v29 = vadd.f32 %v497_v27, %v428_v26  ;;  %v339_v30 = vadd.f32 %v338_v28, %v274_v56  ;;  %v585_v31 = vpop.f32.mrf.mxu0 }
  0xc4   : > { %v1637_v32 = vadd.f32 %v582_v23, %v513_v29 }
  0xc7   : > { %v415_v33 = vpop.f32.mrf.mxu2 }
  0xc8   : > { %v429_v34 = vadd.f32 %v415_v33, %v339_v30  ;;  %v500_v35 = vpop.f32.mrf.mxu3 }
  0xc9   : > { %v340_v36 = vpop.f32.mrf.mxu1 }
  0xca   : > { %v514_v37 = vadd.f32 %v500_v35, %v429_v34  ;;  %v341_v38 = vadd.f32 %v340_v36, %v276_v60  ;;  %v587_v39 = vpop.f32.mrf.mxu0 }
  0xcc   : > { %v1639_v40 = vadd.f32 %v585_v31, %v514_v37 }
  0xcf   : > { %v417_v41 = vpop.f32.mrf.mxu2 }
  0xd0   : > { %v430_v42 = vadd.f32 %v417_v41, %v341_v38  ;;  %v502_v43 = vpop.f32.mrf.mxu3 }
  0xd1   : > { %v1641_v44 = vpop.f32.mrf.mxu1 }
  0xd2   : > { %v515_v45 = vadd.f32 %v502_v43, %v430_v42  ;;  %v1643_v46 = vpop.f32.mrf.mxu0 }
  0xd4   : > { %v1645_v47 = vadd.f32 %v587_v39, %v515_v45 }
  0xd7   : > { %v1647_v48 = vpop.f32.mrf.mxu2 }
  0xd8   : > { %v1649_v49 = vpop.f32.mrf.mxu3 }
  0xd9   : > { %v1651_v50 = vpop.f32.mrf.mxu1 }
  0xda   : > { %v1653_v51 = vpop.f32.mrf.mxu0 }
  0xdf   : > { %v1655_v52 = vpop.f32.mrf.mxu2 }
  0xe0   : > { %v1657_v53 = vpop.f32.mrf.mxu3 }
  0xe1   : > { %v660_v54 = vpop.f32.mrf.mxu1 }
  0xe2   : > { %v918_v55 = vpop.f32.mrf.mxu0  ;;  %v680_v56 = vadd.f32 %v660_v54, %v595_v8 }
  0xe7   : > { %v748_v58 = vpop.f32.mrf.mxu2 }
  0xe8   : > { %v768_v59 = vadd.f32 %v748_v58, %v680_v56  ;;  %v833_v60 = vpop.f32.mrf.mxu3 }
  0xe9   : > { %v662_v62 = vpop.f32.mrf.mxu1 }
  0xea   : > { %v853_v63 = vadd.f32 %v833_v60, %v768_v59  ;;  %v920_v1 = vpop.f32.mrf.mxu0  ;;  %v681_v6 = vadd.f32 %v662_v62, %v596_v16 }
  0xec   : > { %v938_v3 = vadd.f32 %v918_v55, %v853_v63 }
  0xee   : > { %v950_v4 = vadd.f32 %v1662_v0, %v938_v3 }
  0xef   : > { %v750_v7 = vpop.f32.mrf.mxu2 }
  0xf0   : > { %v769_v8 = vadd.f32 %v750_v7, %v681_v6  ;;  %v835_v9 = vpop.f32.mrf.mxu3  ;;  %v958_v11 = vmax.f32 %v950_v4, 0.0  ;;  %v344_v7 = vadd.f32 %v1641_v44, %v1633_v57 }
  0xf1   : > { %v665_v10 = vpop.f32.mrf.mxu1 }
  0xf2   : > { %v854_v13 = vadd.f32 %v835_v9, %v769_v8  ;;  %v923_v14 = vpop.f32.mrf.mxu0  ;;  %v970_v17 = vsub.f32 %v958_v11, %v1668_v12  ;;  %v682_v19 = vadd.f32 %v665_v10, %v597_v24  ;;  %v431_v11 = vadd.f32 %v1647_v48, %v344_v7 }
  0xf4   : > { %v939_v15 = vadd.f32 %v920_v1, %v854_v13  ;;  %v1001_v25 = vmul.f32 %v970_v17, %v970_v17  ;;  %v978_v29 = vsel %vm238_vm1, %v970_v17, 0.0 }
  0xf6   : > { %v951_v18 = vadd.f32 %v1662_v0, %v939_v15  ;;  %v1009_v35 = vsel %vm238_vm1, %v1001_v25, 0.0  ;;  %v346_v25 = vadd.f32 %v1651_v50, %v1635_v61 }
  0xf7   : > { %v753_v20 = vpop.f32.mrf.mxu2 }
  0xf8   : > { %v959_v21 = vmax.f32 %v951_v18, 0.0  ;;  %v770_v22 = vadd.f32 %v753_v20, %v682_v19  ;;  %v838_v23 = vpop.f32.mrf.mxu3  ;;  %v516_v20 = vadd.f32 %v1649_v49, %v431_v11 }
  0xf9   : > { %v667_v16 = vpop.f32.mrf.mxu1 }
  0xfa   : > { %v971_v26 = vsub.f32 %v959_v21, %v1668_v12  ;;  %v855_v27 = vadd.f32 %v838_v23, %v770_v22  ;;  %v925_v28 = vpop.f32.mrf.mxu0  ;;  %v683_v37 = vadd.f32 %v667_v16, %v1637_v32 }
  0xfc   : > { %v979_v30 = vsel %vm238_vm1, %v971_v26, 0.0  ;;  %v1002_v31 = vmul.f32 %v971_v26, %v971_v26  ;;  %v940_v33 = vadd.f32 %v923_v14, %v855_v27 }
  0xfd   : > { %v980_v34 = vadd.f32 %v979_v30, %v978_v29  ;;  %v432_v29 = vadd.f32 %v1655_v52, %v346_v25 }
  0xfe   : > { %v1010_v24 = vsel %vm238_vm1, %v1002_v31, 0.0  ;;  %v952_v36 = vadd.f32 %v1662_v0, %v940_v33 }
  0xff   : > { %v1011_v38 = vadd.f32 %v1010_v24, %v1009_v35  ;;  %v755_v39 = vpop.f32.mrf.mxu2  ;;  %v517_v61 = vadd.f32 %v1657_v53, %v432_v29 }
 0x100   : > { %v960_v41 = vmax.f32 %v952_v36, 0.0  ;;  %v771_v42 = vadd.f32 %v755_v39, %v683_v37  ;;  %v840_v43 = vpop.f32.mrf.mxu3 }
 0x101   : > { %v670_v45 = vpop.f32.mrf.mxu1 }
 0x102   : > { %v972_v54 = vsub.f32 %v960_v41, %v1668_v12  ;;  %v856_v55 = vadd.f32 %v840_v43, %v771_v42  ;;  %v928_v62 = vpop.f32.mrf.mxu0  ;;  %v684_v32 = vadd.f32 %v670_v45, %v1639_v40 }
 0x104   : > { %v981_v56 = vsel %vm238_vm1, %v972_v54, 0.0  ;;  %v1003_v58 = vmul.f32 %v972_v54, %v972_v54  ;;  %v941_v59 = vadd.f32 %v925_v28, %v856_v55  ;;  %v601_v28 = vadd.f32 %v1643_v46, %v516_v20 }
 0x105   : > { %v982_v60 = vadd.f32 %v981_v56, %v980_v34  ;;  %v602_v54 = vadd.f32 %v1653_v51, %v517_v61 }
 0x106   : > { %v1012_v63 = vsel %vm238_vm1, %v1003_v58, 0.0  ;;  %v953_v1 = vadd.f32 %v1662_v0, %v941_v59 }
 0x107   : > { %v1013_v2 = vadd.f32 %v1012_v63, %v1011_v38  ;;  %v758_v3 = vpop.f32.mrf.mxu2 }
 0x108   : > { %v961_v4 = vmax.f32 %v953_v1, 0.0  ;;  %v772_v5 = vadd.f32 %v758_v3, %v684_v32  ;;  %v843_v6 = vpop.f32.mrf.mxu3 }
 0x109   : > { %v672_v8 = vpop.f32.mrf.mxu1 }
 0x10a   : > { %v973_v9 = vsub.f32 %v961_v4, %v1668_v12  ;;  %v857_v10 = vadd.f32 %v843_v6, %v772_v5  ;;  %v685_v19 = vadd.f32 %v672_v8, %v1645_v47  ;;  %v930_v44 = vpop.f32.mrf.mxu0 }
 0x10c   : > { %v983_v13 = vsel %vm238_vm1, %v973_v9, 0.0  ;;  %v1004_v14 = vmul.f32 %v973_v9, %v973_v9  ;;  %v942_v15 = vadd.f32 %v928_v62, %v857_v10 }
 0x10d   : > { %v984_v17 = vadd.f32 %v983_v13, %v982_v60 }
 0x10e   : > { %v1014_v40 = vsel %vm238_vm1, %v1004_v14, 0.0  ;;  %v954_v18 = vadd.f32 %v1662_v0, %v942_v15 }
 0x10f   : > { %v1015_v57 = vadd.f32 %v1014_v40, %v1013_v2  ;;  %v760_v21 = vpop.f32.mrf.mxu2 }
 0x110   : > { %v962_v22 = vmax.f32 %v954_v18, 0.0  ;;  %v773_v23 = vadd.f32 %v760_v21, %v685_v19  ;;  %v845_v16 = vpop.f32.mrf.mxu3 }
 0x111   : > { %v675_v48 = vpop.f32.mrf.mxu1 }
 0x112   : > { %v974_v26 = vsub.f32 %v962_v22, %v1668_v12  ;;  %v858_v27 = vadd.f32 %v845_v16, %v773_v23  ;;  %v686_v35 = vadd.f32 %v675_v48, %v601_v28  ;;  %v933_v46 = vpop.f32.mrf.mxu0 }
 0x114   : > { %v985_v47 = vsel %vm238_vm1, %v974_v26, 0.0  ;;  %v1005_v49 = vmul.f32 %v974_v26, %v974_v26  ;;  %v943_v30 = vadd.f32 %v930_v44, %v858_v27 }
 0x115   : > { %v986_v31 = vadd.f32 %v985_v47, %v984_v17 }
 0x116   : > { %v1016_v33 = vsel %vm238_vm1, %v1005_v49, 0.0  ;;  %v955_v34 = vadd.f32 %v1662_v0, %v943_v30 }
 0x117   : > { %v1017_v24 = vadd.f32 %v1016_v33, %v1015_v57  ;;  %v763_v36 = vpop.f32.mrf.mxu2 }
 0x118   : > { %v963_v50 = vmax.f32 %v955_v34, 0.0  ;;  %v774_v37 = vadd.f32 %v763_v36, %v686_v35  ;;  %v848_v38 = vpop.f32.mrf.mxu3 }
 0x119   : > { %v677_v41 = vpop.f32.mrf.mxu1 }
 0x11a   : > { %v975_v52 = vsub.f32 %v963_v50, %v1668_v12  ;;  %v859_v39 = vadd.f32 %v848_v38, %v774_v37  ;;  %v687_v53 = vadd.f32 %v677_v41, %v602_v54  ;;  %v935_v3 = vpop.f32.mrf.mxu0 }
 0x11c   : > { %v987_v42 = vsel %vm238_vm1, %v975_v52, 0.0  ;;  %v1006_v43 = vmul.f32 %v975_v52, %v975_v52  ;;  %v944_v45 = vadd.f32 %v933_v46, %v859_v39 }
 0x11d   : > { %v988_v55 = vadd.f32 %v987_v42, %v986_v31 }
 0x11e   : > { %v1018_v56 = vsel %vm238_vm1, %v1006_v43, 0.0  ;;  %v956_v58 = vadd.f32 %v1662_v0, %v944_v45 }
 0x11f   : > { %v1019_v59 = vadd.f32 %v1018_v56, %v1017_v24  ;;  %v765_v60 = vpop.f32.mrf.mxu2 }
 0x120   : > { %v964_v62 = vmax.f32 %v956_v58, 0.0  ;;  %v775_v63 = vadd.f32 %v765_v60, %v687_v53  ;;  %v850_v1 = vpop.f32.mrf.mxu3 }
 0x122   : > { %v976_v32 = vsub.f32 %v964_v62, %v1668_v12  ;;  %v860_v2 = vadd.f32 %v850_v1, %v775_v63 }
 0x124   : > { %v989_v4 = vsel %vm238_vm1, %v976_v32, 0.0  ;;  %v1007_v5 = vmul.f32 %v976_v32, %v976_v32  ;;  %v945_v6 = vadd.f32 %v935_v3, %v860_v2 }
 0x125   : > { %v990_v51 = vadd.f32 %v989_v4, %v988_v55 }
 0x126   : > { %v1020_v7 = vsel %vm238_vm1, %v1007_v5, 0.0  ;;  %v957_v8 = vadd.f32 %v1662_v0, %v945_v6 }
 0x127   : > { %v1021_v9 = vadd.f32 %v1020_v7, %v1019_v59 }
 0x128   : > { %v965_v10 = vmax.f32 %v957_v8, 0.0 }
 0x12a   : > { %v977_v11 = vsub.f32 %v965_v10, %v1668_v12 }
 0x12c   : > { %v991_v13 = vsel %vm238_vm1, %v977_v11, 0.0  ;;  %v1008_v14 = vmul.f32 %v977_v11, %v977_v11 }
 0x12d   : > { %v992_v15 = vadd.f32 %v991_v13, %v990_v51 }
 0x12e   : > { %v1022_v17 = vsel %vm238_vm1, %v1008_v14, 0.0 }
 0x12f   : > { %v993_v40 = vrot.slane %v992_v15, 4  ;;  %v1023_v18 = vadd.f32 %v1022_v17, %v1021_v9 }
 0x131   : > { %v994_v19 = vadd.f32 %v993_v40, %v992_v15  ;;  %v1024_v20 = vrot.slane %v1023_v18, 4 }
 0x133   : > { %v995_v57 = vrot.slane %v994_v19, 2  ;;  %v1025_v44 = vadd.f32 %v1024_v20, %v1023_v18 }
 0x135   : > { %v996_v21 = vadd.f32 %v995_v57, %v994_v19  ;;  %v1026_v22 = vrot.slane %v1025_v44, 2 }
 0x137   : > { %v997_v0 = vrot.slane %v996_v21, 1  ;;  %v1027_v23 = vadd.f32 %v1026_v22, %v1025_v44 }
 0x139   : > { %v998_v12 = vadd.f32 %v997_v0, %v996_v21  ;;  %v1028_v16 = vrot.slane %v1027_v23, 1 }
 0x13b   : > { %1000 = vst.msk [vmem:[%s188_s22] sm:$0x1] %vm999_vm2, %v998_v12  ;;  %v1029_v48 = vadd.f32 %v1028_v16, %v1027_v23 }
 0x13d   : > { %1030 = vst.msk [vmem:[%s188_s22 + $0x1] sm:$0x1] %vm999_vm2, %v1029_v48 }
 0x13e PF: > { %s13_s14 = sadd.s32 1, %s1477_s14   ;;  %s1731_s12 = smov %s1473_s13 }
 0x13f   : > { %p10_p5 = scmp.ge.s32.totalorder %s13_s14, 4   ;;  %s1732_s13 = smov %s1734_s15 }
 0x141   :  { %12 = sbr.rel (!%p10_p5) target bundleno = 2 (0x2), region = 79 }

</bundles_post_ra>
